<compile_context>
chip_gen: v6e
topology: v6e:2x2x1
jax: 0.10.0
libtpu: 0.0.40
codegen_flags: <defaults>
</compile_context>

<pallas_src>
import functools
import numpy as np
import jax
import jax.numpy as jnp
from jax.experimental import pallas as pl
from jax.experimental.pallas import tpu as pltpu

LANE = 128


def _cdiv(a, b):
    return -(-a // b)


def _round_up(x, m):
    return _cdiv(x, m) * m


def _vmem_bytes(tc, bp, dp, hp):
    """Rough per-kernel VMEM footprint (double-buffered inputs/outputs + scratch)."""
    x_blk = 2 * tc * bp * dp * 2            # bf16 x chunk, double buffered
    wih = 2 * dp * 4 * hp * 2               # resident W_ih^T (bf16), 2 buffers
    whh = 2 * hp * 4 * hp * 2               # resident W_hh^T (bf16), 2 buffers
    bias = 2 * 8 * 4 * hp * 4               # bias row (padded to 8 sublanes)
    out = 2 * bp * hp * 4                   # h_T output block
    scr = 2 * bp * hp * 4 + tc * bp * 4 * hp * 4   # h/c carries + gates slab
    return x_blk + wih + whh + bias + out + scr


def lstm_chunk_kernel(x_ref, wih_ref, whh_ref, bias_ref, hT_ref,
                      h_ref, c_ref, gx_ref, *, hp, bp, tc, n_pad):
    """One grid step = one time chunk (whole batch).

    x_ref   : (tc*Bp, Dp)   bf16  raw inputs for this chunk (time-major, batch rows packed)
    wih_ref : (Dp, 4*Hp)    bf16  input weights (transposed, padded, gate blocks 128-aligned)
    whh_ref : (Hp, 4*Hp)    bf16  recurrent weights (transposed, padded)
    bias_ref: (1, 4*Hp)     f32   b_ih + b_hh (padded)
    hT_ref  : (Bp, Hp)      f32   output: hidden state at the last timestep
    h_ref, c_ref : (Bp, Hp) f32   LSTM state carried across time chunks
    gx_ref  : (tc*Bp, 4*Hp) f32   per-chunk precomputed input gate pre-activations
    """
    t_chunk = pl.program_id(0)

    @pl.when(t_chunk == 0)
    def _():
        h_ref[...] = jnp.zeros_like(h_ref)
        c_ref[...] = jnp.zeros_like(c_ref)

    # Chunk-wide input projection: one MXU matmul (bf16 in, f32 acc) into VMEM scratch.
    gx_ref[...] = (jnp.dot(x_ref[...], wih_ref[...],
                           preferred_element_type=jnp.float32)
                   + bias_ref[...])

    whh = whh_ref[...]  # hoisted out of the time loop

    def step(t, carry):
        h, c = carry
        row = pl.multiple_of(t * bp, 8)
        gates = gx_ref[pl.ds(row, bp), :] + jnp.dot(
            h.astype(whh.dtype), whh, preferred_element_type=jnp.float32)
        # 128-aligned gate slices (i, f, g, o) -> free vreg selects.
        i_g = jax.nn.sigmoid(gates[:, 0 * hp:1 * hp])
        f_g = jax.nn.sigmoid(gates[:, 1 * hp:2 * hp])
        g_g = jnp.tanh(gates[:, 2 * hp:3 * hp])
        o_g = jax.nn.sigmoid(gates[:, 3 * hp:4 * hp])
        c_new = f_g * c + i_g * g_g
        h_new = o_g * jnp.tanh(c_new)
        if n_pad > 0:
            # Front-padded timesteps: keep the (zero) carry, exactly.
            valid = (t_chunk * tc + t) >= n_pad
            h_new = jnp.where(valid, h_new, h)
            c_new = jnp.where(valid, c_new, c)
        return (h_new, c_new)

    h, c = jax.lax.fori_loop(0, tc, step, (h_ref[...], c_ref[...]),
                             unroll=min(tc, 8))
    h_ref[...] = h
    c_ref[...] = c

    @pl.when(t_chunk == pl.num_programs(0) - 1)
    def _():
        hT_ref[...] = h


@jax.jit
def temporal_model_forward(x, params):
    """x: (B, T, D) float32. Returns (B, O) float32, matching the PyTorch module."""
    B, T, D = x.shape
    H = params["w_hh"].shape[0] // 4
    Hp = _round_up(H, LANE)
    Dp = _round_up(D, LANE)
    Bp = _round_up(B, 8)

    # --- Time chunking: minimize padding, respect a VMEM budget ------------
    n_tc = _cdiv(T, 32)
    tc = _cdiv(T, n_tc)
    budget = 48 * 1024 * 1024
    while tc > 1 and _vmem_bytes(tc, Bp, Dp, Hp) > budget:
        n_tc += 1
        tc = _cdiv(T, n_tc)
    Tp = n_tc * tc
    n_pad = Tp - T

    # --- Lane-aligned, zero-padded weight layouts ---------------------------
    w_ih_t = params["w_ih"].T.reshape(D, 4, H)                      # (D, 4, H)
    w_ih_t = jnp.pad(w_ih_t, ((0, Dp - D), (0, 0), (0, Hp - H)))
    w_ih_t = w_ih_t.reshape(Dp, 4 * Hp).astype(jnp.bfloat16)

    bias = (params["b_ih"] + params["b_hh"]).reshape(4, H)
    bias = jnp.pad(bias, ((0, 0), (0, Hp - H))).reshape(1, 4 * Hp)  # f32

    w_hh_t = params["w_hh"].T.reshape(H, 4, H)                      # (H, 4, H)
    w_hh_t = jnp.pad(w_hh_t, ((0, Hp - H), (0, 0), (0, Hp - H)))
    w_hh_t = w_hh_t.reshape(Hp, 4 * Hp).astype(jnp.bfloat16)

    # --- Raw x, time-major, padded, bf16, packed to (Tp*Bp, Dp) --------------
    x_tm = jnp.transpose(x, (1, 0, 2))                              # (T, B, D)
    x_tm = jnp.pad(x_tm, ((n_pad, 0), (0, Bp - B), (0, Dp - D)))
    x2d = x_tm.astype(jnp.bfloat16).reshape(Tp * Bp, Dp)

    kernel = functools.partial(lstm_chunk_kernel, hp=Hp, bp=Bp, tc=tc, n_pad=n_pad)

    flops = 2 * Tp * Bp * Hp * (4 * Hp) + 2 * Tp * Bp * Dp * (4 * Hp)
    transcendentals = 5 * Tp * Bp * Hp
    bytes_accessed = (Tp * Bp * Dp * 2 + Dp * 4 * Hp * 2 + Hp * 4 * Hp * 2
                      + 4 * Hp * 4 + Bp * Hp * 4)
    vmem_limit = int(min(max(2 * _vmem_bytes(tc, Bp, Dp, Hp), 32 * 1024 * 1024),
                         56 * 1024 * 1024))

    h_T = pl.pallas_call(
        kernel,
        out_shape=jax.ShapeDtypeStruct((Bp, Hp), jnp.float32),
        grid_spec=pltpu.PrefetchScalarGridSpec(
            num_scalar_prefetch=0,
            grid=(n_tc,),
            in_specs=[
                pl.BlockSpec((tc * Bp, Dp), lambda t: (t, 0)),   # x chunk (streamed)
                pl.BlockSpec((Dp, 4 * Hp), lambda t: (0, 0)),    # W_ih^T (resident)
                pl.BlockSpec((Hp, 4 * Hp), lambda t: (0, 0)),    # W_hh^T (resident)
                pl.BlockSpec((1, 4 * Hp), lambda t: (0, 0)),     # bias   (resident)
            ],
            out_specs=pl.BlockSpec((Bp, Hp), lambda t: (0, 0)),
            scratch_shapes=[
                pltpu.VMEM((Bp, Hp), jnp.float32),               # h carry
                pltpu.VMEM((Bp, Hp), jnp.float32),               # c carry
                pltpu.VMEM((tc * Bp, 4 * Hp), jnp.float32),      # per-chunk gates_x
            ],
        ),
        compiler_params=pltpu.CompilerParams(
            dimension_semantics=("arbitrary",),
            vmem_limit_bytes=vmem_limit,
        ),
        cost_estimate=pl.CostEstimate(
            flops=flops,
            transcendentals=transcendentals,
            bytes_accessed=bytes_accessed,
        ),
    )(x2d, w_ih_t, w_hh_t, bias)

    # Final Linear on the last timestep, outside the kernel (O << 128 lanes would
    # otherwise force masked partial stores inside the kernel).
    return h_T[:B, :H] @ params["w_fc"].T + params["b_fc"]


def reference_forward(x, params):
    """Pure-JAX reference mirroring PyTorch nn.LSTM(batch_first=True) + Linear."""
    B, T, D = x.shape
    H = params["w_hh"].shape[0] // 4
    w_ih_t = params["w_ih"].T
    w_hh_t = params["w_hh"].T
    b = params["b_ih"] + params["b_hh"]

    def step(carry, x_t):
        h, c = carry
        gates = x_t @ w_ih_t + h @ w_hh_t + b
        i = jax.nn.sigmoid(gates[:, 0 * H:1 * H])
        f = jax.nn.sigmoid(gates[:, 1 * H:2 * H])
        g = jnp.tanh(gates[:, 2 * H:3 * H])
        o = jax.nn.sigmoid(gates[:, 3 * H:4 * H])
        c = f * c + i * g
        h = o * jnp.tanh(c)
        return (h, c), None

    h0 = jnp.zeros((B, H), jnp.float32)
    c0 = jnp.zeros((B, H), jnp.float32)
    (h_T, _), _ = jax.lax.scan(step, (h0, c0), jnp.transpose(x, (1, 0, 2)))
    return h_T @ params["w_fc"].T + params["b_fc"]


def init_params(key, input_dim, hidden_dim, output_dim):
    """Deterministic init matching the PyTorch parameter shapes (gate order i,f,g,o)."""
    ks = jax.random.split(key, 6)
    s = 1.0 / np.sqrt(hidden_dim)
    return {
        "w_ih": jax.random.uniform(ks[0], (4 * hidden_dim, input_dim), jnp.float32, -s, s),
        "w_hh": jax.random.uniform(ks[1], (4 * hidden_dim, hidden_dim), jnp.float32, -s, s),
        "b_ih": jax.random.uniform(ks[2], (4 * hidden_dim,), jnp.float32, -s, s),
        "b_hh": jax.random.uniform(ks[3], (4 * hidden_dim,), jnp.float32, -s, s),
        "w_fc": jax.random.uniform(ks[4], (output_dim, hidden_dim), jnp.float32, -s, s),
        "b_fc": jax.random.uniform(ks[5], (output_dim,), jnp.float32, -s, s),
    }


if __name__ == "__main__":
    B, T = 2, 8
    input_dim, hidden_dim, output_dim = 4, 32, 4

    key = jax.random.PRNGKey(0)
    k_x, k_p = jax.random.split(key)
    x = jax.random.normal(k_x, (B, T, input_dim), jnp.float32)
    params = init_params(k_p, input_dim, hidden_dim, output_dim)

    out = jax.block_until_ready(temporal_model_forward(x, params))
    ref = jax.block_until_ready(reference_forward(x, params))

    # Tolerance accounts for the bf16 MXU paths (input projection + recurrent weights),
    # both with f32 accumulation.
    np.testing.assert_allclose(np.asarray(out), np.asarray(ref), rtol=2e-2, atol=2e-2)

    print("KERNEL_OK")
</pallas_src>

<mosaic_0001>
module attributes {stable_mosaic.version = 11 : i64} {
  func.func @lstm_chunk_kernel(%arg0: i32, %arg1: memref<64x128xbf16, #tpu.memory_space<vmem>>, %arg2: memref<128x512xbf16, #tpu.memory_space<vmem>>, %arg3: memref<128x512xbf16, #tpu.memory_space<vmem>>, %arg4: memref<1x512xf32, #tpu.memory_space<vmem>>, %arg5: memref<8x128xf32, #tpu.memory_space<vmem>>, %arg6: memref<8x128xf32, #tpu.memory_space<vmem>>, %arg7: memref<8x128xf32, #tpu.memory_space<vmem>>, %arg8: memref<64x512xf32, #tpu.memory_space<vmem>>) attributes {dimension_semantics = [#tpu.dimension_semantics<arbitrary>], iteration_bounds = array<i64: 1>, scalar_prefetch = 0 : i64, scratch_operands = 3 : i64, tpu.core_type = #tpu.core_type<tc>, window_params = [{transform_indices = @transform_0, window_bounds = array<i64: 64, 128>}, {pipeline_mode = #tpu.pipeline_mode<synchronous>, transform_indices = @transform_1, window_bounds = array<i64: 128, 512>}, {pipeline_mode = #tpu.pipeline_mode<synchronous>, transform_indices = @transform_2, window_bounds = array<i64: 128, 512>}, {pipeline_mode = #tpu.pipeline_mode<synchronous>, transform_indices = @transform_3, window_bounds = array<i64: 1, 512>}, {pipeline_mode = #tpu.pipeline_mode<synchronous>, transform_indices = @transform_4, window_bounds = array<i64: 8, 128>}]} {
    %c0_i32 = arith.constant 0 : i32
    %0 = arith.cmpi eq, %arg0, %c0_i32 : i32
    %1 = arith.extui %0 : i1 to i32
    %c0_i32_0 = arith.constant 0 : i32
    %2 = arith.cmpi ne, %1, %c0_i32_0 : i32
    scf.if %2 {
      %cst_69 = arith.constant 0.000000e+00 : f32
      %274 = vector.broadcast %cst_69 : f32 to vector<8x128xf32>
      %c0_70 = arith.constant 0 : index
      %c0_71 = arith.constant 0 : index
      %275 = vector.load %arg6[%c0_70, %c0_71] : memref<8x128xf32, #tpu.memory_space<vmem>>, vector<8x128xf32>
      tpu.vector_store %arg6[%c0_70, %c0_71], %274 {strides = array<i32>} : memref<8x128xf32, #tpu.memory_space<vmem>>, vector<8x128xf32>,
      %cst_72 = arith.constant 0.000000e+00 : f32
      %276 = vector.broadcast %cst_72 : f32 to vector<8x128xf32>
      %c0_73 = arith.constant 0 : index
      %c0_74 = arith.constant 0 : index
      %277 = vector.load %arg7[%c0_73, %c0_74] : memref<8x128xf32, #tpu.memory_space<vmem>>, vector<8x128xf32>
      tpu.vector_store %arg7[%c0_73, %c0_74], %276 {strides = array<i32>} : memref<8x128xf32, #tpu.memory_space<vmem>>, vector<8x128xf32>,
    } else {
    }
    %c0 = arith.constant 0 : index
    %c0_1 = arith.constant 0 : index
    %3 = vector.load %arg1[%c0, %c0_1] : memref<64x128xbf16, #tpu.memory_space<vmem>>, vector<64x128xbf16>
    %c0_2 = arith.constant 0 : index
    %c0_3 = arith.constant 0 : index
    %4 = vector.load %arg2[%c0_2, %c0_3] : memref<128x512xbf16, #tpu.memory_space<vmem>>, vector<128x512xbf16>
    %cst = arith.constant dense<0.000000e+00> : vector<64x512xf32>
    %5 = tpu.matmul %3, %4, %cst {dimension_numbers = #tpu.dot_dimension_numbers<[1], [0], [0], [1], [0, 0, 1, 1], [], []>} : vector<64x128xbf16>, vector<128x512xbf16>, vector<64x512xf32> -> vector<64x512xf32>
    %c0_4 = arith.constant 0 : index
    %c0_5 = arith.constant 0 : index
    %6 = vector.load %arg4[%c0_4, %c0_5] : memref<1x512xf32, #tpu.memory_space<vmem>>, vector<1x512xf32>
    %7 = vector.broadcast %6 : vector<1x512xf32> to vector<64x512xf32>
    %8 = arith.addf %5, %7 : vector<64x512xf32>
    %c0_6 = arith.constant 0 : index
    %c0_7 = arith.constant 0 : index
    %9 = vector.load %arg8[%c0_6, %c0_7] : memref<64x512xf32, #tpu.memory_space<vmem>>, vector<64x512xf32>
    tpu.vector_store %arg8[%c0_6, %c0_7], %8 {strides = array<i32>} : memref<64x512xf32, #tpu.memory_space<vmem>>, vector<64x512xf32>,
    %c0_8 = arith.constant 0 : index
    %c0_9 = arith.constant 0 : index
    %10 = vector.load %arg3[%c0_8, %c0_9] : memref<128x512xbf16, #tpu.memory_space<vmem>>, vector<128x512xbf16>
    %c0_10 = arith.constant 0 : index
    %c0_11 = arith.constant 0 : index
    %11 = vector.load %arg6[%c0_10, %c0_11] : memref<8x128xf32, #tpu.memory_space<vmem>>, vector<8x128xf32>
    %c0_12 = arith.constant 0 : index
    %c0_13 = arith.constant 0 : index
    %12 = vector.load %arg7[%c0_12, %c0_13] : memref<8x128xf32, #tpu.memory_space<vmem>>, vector<8x128xf32>
    %c0_i32_14 = arith.constant 0 : i32
    %c8_i32 = arith.constant 8 : i32
    %13 = arith.muli %c0_i32_14, %c8_i32 : i32
    %14 = tpu.assume_multiple %13, 8 : i32
    %15 = arith.index_cast %14 : i32 to index
    %c0_15 = arith.constant 0 : index
    %16 = vector.load %arg8[%15, %c0_15] : memref<64x512xf32, #tpu.memory_space<vmem>>, vector<8x512xf32>
    %17 = arith.truncf %11 : vector<8x128xf32> to vector<8x128xbf16>
    %cst_16 = arith.constant dense<0.000000e+00> : vector<8x512xf32>
    %18 = tpu.matmul %17, %10, %cst_16 {dimension_numbers = #tpu.dot_dimension_numbers<[1], [0], [0], [1], [0, 0, 1, 1], [], []>} : vector<8x128xbf16>, vector<128x512xbf16>, vector<8x512xf32> -> vector<8x512xf32>
    %19 = arith.addf %16, %18 : vector<8x512xf32>
    %20 = vector.extract_strided_slice %19 {offsets = [0, 0], sizes = [8, 128], strides = [1, 1]} : vector<8x512xf32> to vector<8x128xf32>
    %21 = arith.negf %20 : vector<8x128xf32>
    %22 = math.exp %21 : vector<8x128xf32>
    %cst_17 = arith.constant 1.000000e+00 : f32
    %23 = vector.broadcast %cst_17 : f32 to vector<8x128xf32>
    %24 = arith.addf %23, %22 : vector<8x128xf32>
    %25 = arith.divf %23, %24 : vector<8x128xf32>
    %26 = vector.extract_strided_slice %19 {offsets = [0, 128], sizes = [8, 128], strides = [1, 1]} : vector<8x512xf32> to vector<8x128xf32>
    %27 = arith.negf %26 : vector<8x128xf32>
    %28 = math.exp %27 : vector<8x128xf32>
    %cst_18 = arith.constant 1.000000e+00 : f32
    %29 = vector.broadcast %cst_18 : f32 to vector<8x128xf32>
    %30 = arith.addf %29, %28 : vector<8x128xf32>
    %31 = arith.divf %29, %30 : vector<8x128xf32>
    %32 = vector.extract_strided_slice %19 {offsets = [0, 256], sizes = [8, 128], strides = [1, 1]} : vector<8x512xf32> to vector<8x128xf32>
    %33 = math.tanh %32 : vector<8x128xf32>
    %34 = vector.extract_strided_slice %19 {offsets = [0, 384], sizes = [8, 128], strides = [1, 1]} : vector<8x512xf32> to vector<8x128xf32>
    %35 = arith.negf %34 : vector<8x128xf32>
    %36 = math.exp %35 : vector<8x128xf32>
    %cst_19 = arith.constant 1.000000e+00 : f32
    %37 = vector.broadcast %cst_19 : f32 to vector<8x128xf32>
    %38 = arith.addf %37, %36 : vector<8x128xf32>
    %39 = arith.divf %37, %38 : vector<8x128xf32>
    %40 = arith.mulf %31, %12 : vector<8x128xf32>
    %41 = arith.mulf %25, %33 : vector<8x128xf32>
    %42 = arith.addf %40, %41 : vector<8x128xf32>
    %43 = math.tanh %42 : vector<8x128xf32>
    %44 = arith.mulf %39, %43 : vector<8x128xf32>
    %c1_i32 = arith.constant 1 : i32
    %c8_i32_20 = arith.constant 8 : i32
    %45 = arith.muli %c1_i32, %c8_i32_20 : i32
    %46 = tpu.assume_multiple %45, 8 : i32
    %47 = arith.index_cast %46 : i32 to index
    %c0_21 = arith.constant 0 : index
    %48 = vector.load %arg8[%47, %c0_21] : memref<64x512xf32, #tpu.memory_space<vmem>>, vector<8x512xf32>
    %49 = arith.truncf %44 : vector<8x128xf32> to vector<8x128xbf16>
    %cst_22 = arith.constant dense<0.000000e+00> : vector<8x512xf32>
    %50 = tpu.matmul %49, %10, %cst_22 {dimension_numbers = #tpu.dot_dimension_numbers<[1], [0], [0], [1], [0, 0, 1, 1], [], []>} : vector<8x128xbf16>, vector<128x512xbf16>, vector<8x512xf32> -> vector<8x512xf32>
    %51 = arith.addf %48, %50 : vector<8x512xf32>
    %52 = vector.extract_strided_slice %51 {offsets = [0, 0], sizes = [8, 128], strides = [1, 1]} : vector<8x512xf32> to vector<8x128xf32>
    %53 = arith.negf %52 : vector<8x128xf32>
    %54 = math.exp %53 : vector<8x128xf32>
    %cst_23 = arith.constant 1.000000e+00 : f32
    %55 = vector.broadcast %cst_23 : f32 to vector<8x128xf32>
    %56 = arith.addf %55, %54 : vector<8x128xf32>
    %57 = arith.divf %55, %56 : vector<8x128xf32>
    %58 = vector.extract_strided_slice %51 {offsets = [0, 128], sizes = [8, 128], strides = [1, 1]} : vector<8x512xf32> to vector<8x128xf32>
    %59 = arith.negf %58 : vector<8x128xf32>
    %60 = math.exp %59 : vector<8x128xf32>
    %cst_24 = arith.constant 1.000000e+00 : f32
    %61 = vector.broadcast %cst_24 : f32 to vector<8x128xf32>
    %62 = arith.addf %61, %60 : vector<8x128xf32>
    %63 = arith.divf %61, %62 : vector<8x128xf32>
    %64 = vector.extract_strided_slice %51 {offsets = [0, 256], sizes = [8, 128], strides = [1, 1]} : vector<8x512xf32> to vector<8x128xf32>
    %65 = math.tanh %64 : vector<8x128xf32>
    %66 = vector.extract_strided_slice %51 {offsets = [0, 384], sizes = [8, 128], strides = [1, 1]} : vector<8x512xf32> to vector<8x128xf32>
    %67 = arith.negf %66 : vector<8x128xf32>
    %68 = math.exp %67 : vector<8x128xf32>
    %cst_25 = arith.constant 1.000000e+00 : f32
    %69 = vector.broadcast %cst_25 : f32 to vector<8x128xf32>
    %70 = arith.addf %69, %68 : vector<8x128xf32>
    %71 = arith.divf %69, %70 : vector<8x128xf32>
    %72 = arith.mulf %63, %42 : vector<8x128xf32>
    %73 = arith.mulf %57, %65 : vector<8x128xf32>
    %74 = arith.addf %72, %73 : vector<8x128xf32>
    %75 = math.tanh %74 : vector<8x128xf32>
    %76 = arith.mulf %71, %75 : vector<8x128xf32>
    %c2_i32 = arith.constant 2 : i32
    %c8_i32_26 = arith.constant 8 : i32
    %77 = arith.muli %c2_i32, %c8_i32_26 : i32
    %78 = tpu.assume_multiple %77, 8 : i32
    %79 = arith.index_cast %78 : i32 to index
    %c0_27 = arith.constant 0 : index
    %80 = vector.load %arg8[%79, %c0_27] : memref<64x512xf32, #tpu.memory_space<vmem>>, vector<8x512xf32>
    %81 = arith.truncf %76 : vector<8x128xf32> to vector<8x128xbf16>
    %cst_28 = arith.constant dense<0.000000e+00> : vector<8x512xf32>
    %82 = tpu.matmul %81, %10, %cst_28 {dimension_numbers = #tpu.dot_dimension_numbers<[1], [0], [0], [1], [0, 0, 1, 1], [], []>} : vector<8x128xbf16>, vector<128x512xbf16>, vector<8x512xf32> -> vector<8x512xf32>
    %83 = arith.addf %80, %82 : vector<8x512xf32>
    %84 = vector.extract_strided_slice %83 {offsets = [0, 0], sizes = [8, 128], strides = [1, 1]} : vector<8x512xf32> to vector<8x128xf32>
    %85 = arith.negf %84 : vector<8x128xf32>
    %86 = math.exp %85 : vector<8x128xf32>
    %cst_29 = arith.constant 1.000000e+00 : f32
    %87 = vector.broadcast %cst_29 : f32 to vector<8x128xf32>
    %88 = arith.addf %87, %86 : vector<8x128xf32>
    %89 = arith.divf %87, %88 : vector<8x128xf32>
    %90 = vector.extract_strided_slice %83 {offsets = [0, 128], sizes = [8, 128], strides = [1, 1]} : vector<8x512xf32> to vector<8x128xf32>
    %91 = arith.negf %90 : vector<8x128xf32>
    %92 = math.exp %91 : vector<8x128xf32>
    %cst_30 = arith.constant 1.000000e+00 : f32
    %93 = vector.broadcast %cst_30 : f32 to vector<8x128xf32>
    %94 = arith.addf %93, %92 : vector<8x128xf32>
    %95 = arith.divf %93, %94 : vector<8x128xf32>
    %96 = vector.extract_strided_slice %83 {offsets = [0, 256], sizes = [8, 128], strides = [1, 1]} : vector<8x512xf32> to vector<8x128xf32>
    %97 = math.tanh %96 : vector<8x128xf32>
    %98 = vector.extract_strided_slice %83 {offsets = [0, 384], sizes = [8, 128], strides = [1, 1]} : vector<8x512xf32> to vector<8x128xf32>
    %99 = arith.negf %98 : vector<8x128xf32>
    %100 = math.exp %99 : vector<8x128xf32>
    %cst_31 = arith.constant 1.000000e+00 : f32
    %101 = vector.broadcast %cst_31 : f32 to vector<8x128xf32>
    %102 = arith.addf %101, %100 : vector<8x128xf32>
    %103 = arith.divf %101, %102 : vector<8x128xf32>
    %104 = arith.mulf %95, %74 : vector<8x128xf32>
    %105 = arith.mulf %89, %97 : vector<8x128xf32>
    %106 = arith.addf %104, %105 : vector<8x128xf32>
    %107 = math.tanh %106 : vector<8x128xf32>
    %108 = arith.mulf %103, %107 : vector<8x128xf32>
    %c3_i32 = arith.constant 3 : i32
    %c8_i32_32 = arith.constant 8 : i32
    %109 = arith.muli %c3_i32, %c8_i32_32 : i32
    %110 = tpu.assume_multiple %109, 8 : i32
    %111 = arith.index_cast %110 : i32 to index
    %c0_33 = arith.constant 0 : index
    %112 = vector.load %arg8[%111, %c0_33] : memref<64x512xf32, #tpu.memory_space<vmem>>, vector<8x512xf32>
    %113 = arith.truncf %108 : vector<8x128xf32> to vector<8x128xbf16>
    %cst_34 = arith.constant dense<0.000000e+00> : vector<8x512xf32>
    %114 = tpu.matmul %113, %10, %cst_34 {dimension_numbers = #tpu.dot_dimension_numbers<[1], [0], [0], [1], [0, 0, 1, 1], [], []>} : vector<8x128xbf16>, vector<128x512xbf16>, vector<8x512xf32> -> vector<8x512xf32>
    %115 = arith.addf %112, %114 : vector<8x512xf32>
    %116 = vector.extract_strided_slice %115 {offsets = [0, 0], sizes = [8, 128], strides = [1, 1]} : vector<8x512xf32> to vector<8x128xf32>
    %117 = arith.negf %116 : vector<8x128xf32>
    %118 = math.exp %117 : vector<8x128xf32>
    %cst_35 = arith.constant 1.000000e+00 : f32
    %119 = vector.broadcast %cst_35 : f32 to vector<8x128xf32>
    %120 = arith.addf %119, %118 : vector<8x128xf32>
    %121 = arith.divf %119, %120 : vector<8x128xf32>
    %122 = vector.extract_strided_slice %115 {offsets = [0, 128], sizes = [8, 128], strides = [1, 1]} : vector<8x512xf32> to vector<8x128xf32>
    %123 = arith.negf %122 : vector<8x128xf32>
    %124 = math.exp %123 : vector<8x128xf32>
    %cst_36 = arith.constant 1.000000e+00 : f32
    %125 = vector.broadcast %cst_36 : f32 to vector<8x128xf32>
    %126 = arith.addf %125, %124 : vector<8x128xf32>
    %127 = arith.divf %125, %126 : vector<8x128xf32>
    %128 = vector.extract_strided_slice %115 {offsets = [0, 256], sizes = [8, 128], strides = [1, 1]} : vector<8x512xf32> to vector<8x128xf32>
    %129 = math.tanh %128 : vector<8x128xf32>
    %130 = vector.extract_strided_slice %115 {offsets = [0, 384], sizes = [8, 128], strides = [1, 1]} : vector<8x512xf32> to vector<8x128xf32>
    %131 = arith.negf %130 : vector<8x128xf32>
    %132 = math.exp %131 : vector<8x128xf32>
    %cst_37 = arith.constant 1.000000e+00 : f32
    %133 = vector.broadcast %cst_37 : f32 to vector<8x128xf32>
    %134 = arith.addf %133, %132 : vector<8x128xf32>
    %135 = arith.divf %133, %134 : vector<8x128xf32>
    %136 = arith.mulf %127, %106 : vector<8x128xf32>
    %137 = arith.mulf %121, %129 : vector<8x128xf32>
    %138 = arith.addf %136, %137 : vector<8x128xf32>
    %139 = math.tanh %138 : vector<8x128xf32>
    %140 = arith.mulf %135, %139 : vector<8x128xf32>
    %c4_i32 = arith.constant 4 : i32
    %c8_i32_38 = arith.constant 8 : i32
    %141 = arith.muli %c4_i32, %c8_i32_38 : i32
    %142 = tpu.assume_multiple %141, 8 : i32
    %143 = arith.index_cast %142 : i32 to index
    %c0_39 = arith.constant 0 : index
    %144 = vector.load %arg8[%143, %c0_39] : memref<64x512xf32, #tpu.memory_space<vmem>>, vector<8x512xf32>
    %145 = arith.truncf %140 : vector<8x128xf32> to vector<8x128xbf16>
    %cst_40 = arith.constant dense<0.000000e+00> : vector<8x512xf32>
    %146 = tpu.matmul %145, %10, %cst_40 {dimension_numbers = #tpu.dot_dimension_numbers<[1], [0], [0], [1], [0, 0, 1, 1], [], []>} : vector<8x128xbf16>, vector<128x512xbf16>, vector<8x512xf32> -> vector<8x512xf32>
    %147 = arith.addf %144, %146 : vector<8x512xf32>
    %148 = vector.extract_strided_slice %147 {offsets = [0, 0], sizes = [8, 128], strides = [1, 1]} : vector<8x512xf32> to vector<8x128xf32>
    %149 = arith.negf %148 : vector<8x128xf32>
    %150 = math.exp %149 : vector<8x128xf32>
    %cst_41 = arith.constant 1.000000e+00 : f32
    %151 = vector.broadcast %cst_41 : f32 to vector<8x128xf32>
    %152 = arith.addf %151, %150 : vector<8x128xf32>
    %153 = arith.divf %151, %152 : vector<8x128xf32>
    %154 = vector.extract_strided_slice %147 {offsets = [0, 128], sizes = [8, 128], strides = [1, 1]} : vector<8x512xf32> to vector<8x128xf32>
    %155 = arith.negf %154 : vector<8x128xf32>
    %156 = math.exp %155 : vector<8x128xf32>
    %cst_42 = arith.constant 1.000000e+00 : f32
    %157 = vector.broadcast %cst_42 : f32 to vector<8x128xf32>
    %158 = arith.addf %157, %156 : vector<8x128xf32>
    %159 = arith.divf %157, %158 : vector<8x128xf32>
    %160 = vector.extract_strided_slice %147 {offsets = [0, 256], sizes = [8, 128], strides = [1, 1]} : vector<8x512xf32> to vector<8x128xf32>
    %161 = math.tanh %160 : vector<8x128xf32>
    %162 = vector.extract_strided_slice %147 {offsets = [0, 384], sizes = [8, 128], strides = [1, 1]} : vector<8x512xf32> to vector<8x128xf32>
    %163 = arith.negf %162 : vector<8x128xf32>
    %164 = math.exp %163 : vector<8x128xf32>
    %cst_43 = arith.constant 1.000000e+00 : f32
    %165 = vector.broadcast %cst_43 : f32 to vector<8x128xf32>
    %166 = arith.addf %165, %164 : vector<8x128xf32>
    %167 = arith.divf %165, %166 : vector<8x128xf32>
    %168 = arith.mulf %159, %138 : vector<8x128xf32>
    %169 = arith.mulf %153, %161 : vector<8x128xf32>
    %170 = arith.addf %168, %169 : vector<8x128xf32>
    %171 = math.tanh %170 : vector<8x128xf32>
    %172 = arith.mulf %167, %171 : vector<8x128xf32>
    %c5_i32 = arith.constant 5 : i32
    %c8_i32_44 = arith.constant 8 : i32
    %173 = arith.muli %c5_i32, %c8_i32_44 : i32
    %174 = tpu.assume_multiple %173, 8 : i32
    %175 = arith.index_cast %174 : i32 to index
    %c0_45 = arith.constant 0 : index
    %176 = vector.load %arg8[%175, %c0_45] : memref<64x512xf32, #tpu.memory_space<vmem>>, vector<8x512xf32>
    %177 = arith.truncf %172 : vector<8x128xf32> to vector<8x128xbf16>
    %cst_46 = arith.constant dense<0.000000e+00> : vector<8x512xf32>
    %178 = tpu.matmul %177, %10, %cst_46 {dimension_numbers = #tpu.dot_dimension_numbers<[1], [0], [0], [1], [0, 0, 1, 1], [], []>} : vector<8x128xbf16>, vector<128x512xbf16>, vector<8x512xf32> -> vector<8x512xf32>
    %179 = arith.addf %176, %178 : vector<8x512xf32>
    %180 = vector.extract_strided_slice %179 {offsets = [0, 0], sizes = [8, 128], strides = [1, 1]} : vector<8x512xf32> to vector<8x128xf32>
    %181 = arith.negf %180 : vector<8x128xf32>
    %182 = math.exp %181 : vector<8x128xf32>
    %cst_47 = arith.constant 1.000000e+00 : f32
    %183 = vector.broadcast %cst_47 : f32 to vector<8x128xf32>
    %184 = arith.addf %183, %182 : vector<8x128xf32>
    %185 = arith.divf %183, %184 : vector<8x128xf32>
    %186 = vector.extract_strided_slice %179 {offsets = [0, 128], sizes = [8, 128], strides = [1, 1]} : vector<8x512xf32> to vector<8x128xf32>
    %187 = arith.negf %186 : vector<8x128xf32>
    %188 = math.exp %187 : vector<8x128xf32>
    %cst_48 = arith.constant 1.000000e+00 : f32
    %189 = vector.broadcast %cst_48 : f32 to vector<8x128xf32>
    %190 = arith.addf %189, %188 : vector<8x128xf32>
    %191 = arith.divf %189, %190 : vector<8x128xf32>
    %192 = vector.extract_strided_slice %179 {offsets = [0, 256], sizes = [8, 128], strides = [1, 1]} : vector<8x512xf32> to vector<8x128xf32>
    %193 = math.tanh %192 : vector<8x128xf32>
    %194 = vector.extract_strided_slice %179 {offsets = [0, 384], sizes = [8, 128], strides = [1, 1]} : vector<8x512xf32> to vector<8x128xf32>
    %195 = arith.negf %194 : vector<8x128xf32>
    %196 = math.exp %195 : vector<8x128xf32>
    %cst_49 = arith.constant 1.000000e+00 : f32
    %197 = vector.broadcast %cst_49 : f32 to vector<8x128xf32>
    %198 = arith.addf %197, %196 : vector<8x128xf32>
    %199 = arith.divf %197, %198 : vector<8x128xf32>
    %200 = arith.mulf %191, %170 : vector<8x128xf32>
    %201 = arith.mulf %185, %193 : vector<8x128xf32>
    %202 = arith.addf %200, %201 : vector<8x128xf32>
    %203 = math.tanh %202 : vector<8x128xf32>
    %204 = arith.mulf %199, %203 : vector<8x128xf32>
    %c6_i32 = arith.constant 6 : i32
    %c8_i32_50 = arith.constant 8 : i32
    %205 = arith.muli %c6_i32, %c8_i32_50 : i32
    %206 = tpu.assume_multiple %205, 8 : i32
    %207 = arith.index_cast %206 : i32 to index
    %c0_51 = arith.constant 0 : index
    %208 = vector.load %arg8[%207, %c0_51] : memref<64x512xf32, #tpu.memory_space<vmem>>, vector<8x512xf32>
    %209 = arith.truncf %204 : vector<8x128xf32> to vector<8x128xbf16>
    %cst_52 = arith.constant dense<0.000000e+00> : vector<8x512xf32>
    %210 = tpu.matmul %209, %10, %cst_52 {dimension_numbers = #tpu.dot_dimension_numbers<[1], [0], [0], [1], [0, 0, 1, 1], [], []>} : vector<8x128xbf16>, vector<128x512xbf16>, vector<8x512xf32> -> vector<8x512xf32>
    %211 = arith.addf %208, %210 : vector<8x512xf32>
    %212 = vector.extract_strided_slice %211 {offsets = [0, 0], sizes = [8, 128], strides = [1, 1]} : vector<8x512xf32> to vector<8x128xf32>
    %213 = arith.negf %212 : vector<8x128xf32>
    %214 = math.exp %213 : vector<8x128xf32>
    %cst_53 = arith.constant 1.000000e+00 : f32
    %215 = vector.broadcast %cst_53 : f32 to vector<8x128xf32>
    %216 = arith.addf %215, %214 : vector<8x128xf32>
    %217 = arith.divf %215, %216 : vector<8x128xf32>
    %218 = vector.extract_strided_slice %211 {offsets = [0, 128], sizes = [8, 128], strides = [1, 1]} : vector<8x512xf32> to vector<8x128xf32>
    %219 = arith.negf %218 : vector<8x128xf32>
    %220 = math.exp %219 : vector<8x128xf32>
    %cst_54 = arith.constant 1.000000e+00 : f32
    %221 = vector.broadcast %cst_54 : f32 to vector<8x128xf32>
    %222 = arith.addf %221, %220 : vector<8x128xf32>
    %223 = arith.divf %221, %222 : vector<8x128xf32>
    %224 = vector.extract_strided_slice %211 {offsets = [0, 256], sizes = [8, 128], strides = [1, 1]} : vector<8x512xf32> to vector<8x128xf32>
    %225 = math.tanh %224 : vector<8x128xf32>
    %226 = vector.extract_strided_slice %211 {offsets = [0, 384], sizes = [8, 128], strides = [1, 1]} : vector<8x512xf32> to vector<8x128xf32>
    %227 = arith.negf %226 : vector<8x128xf32>
    %228 = math.exp %227 : vector<8x128xf32>
    %cst_55 = arith.constant 1.000000e+00 : f32
    %229 = vector.broadcast %cst_55 : f32 to vector<8x128xf32>
    %230 = arith.addf %229, %228 : vector<8x128xf32>
    %231 = arith.divf %229, %230 : vector<8x128xf32>
    %232 = arith.mulf %223, %202 : vector<8x128xf32>
    %233 = arith.mulf %217, %225 : vector<8x128xf32>
    %234 = arith.addf %232, %233 : vector<8x128xf32>
    %235 = math.tanh %234 : vector<8x128xf32>
    %236 = arith.mulf %231, %235 : vector<8x128xf32>
    %c7_i32 = arith.constant 7 : i32
    %c8_i32_56 = arith.constant 8 : i32
    %237 = arith.muli %c7_i32, %c8_i32_56 : i32
    %238 = tpu.assume_multiple %237, 8 : i32
    %239 = arith.index_cast %238 : i32 to index
    %c0_57 = arith.constant 0 : index
    %240 = vector.load %arg8[%239, %c0_57] : memref<64x512xf32, #tpu.memory_space<vmem>>, vector<8x512xf32>
    %241 = arith.truncf %236 : vector<8x128xf32> to vector<8x128xbf16>
    %cst_58 = arith.constant dense<0.000000e+00> : vector<8x512xf32>
    %242 = tpu.matmul %241, %10, %cst_58 {dimension_numbers = #tpu.dot_dimension_numbers<[1], [0], [0], [1], [0, 0, 1, 1], [], []>} : vector<8x128xbf16>, vector<128x512xbf16>, vector<8x512xf32> -> vector<8x512xf32>
    %243 = arith.addf %240, %242 : vector<8x512xf32>
    %244 = vector.extract_strided_slice %243 {offsets = [0, 0], sizes = [8, 128], strides = [1, 1]} : vector<8x512xf32> to vector<8x128xf32>
    %245 = arith.negf %244 : vector<8x128xf32>
    %246 = math.exp %245 : vector<8x128xf32>
    %cst_59 = arith.constant 1.000000e+00 : f32
    %247 = vector.broadcast %cst_59 : f32 to vector<8x128xf32>
    %248 = arith.addf %247, %246 : vector<8x128xf32>
    %249 = arith.divf %247, %248 : vector<8x128xf32>
    %250 = vector.extract_strided_slice %243 {offsets = [0, 128], sizes = [8, 128], strides = [1, 1]} : vector<8x512xf32> to vector<8x128xf32>
    %251 = arith.negf %250 : vector<8x128xf32>
    %252 = math.exp %251 : vector<8x128xf32>
    %cst_60 = arith.constant 1.000000e+00 : f32
    %253 = vector.broadcast %cst_60 : f32 to vector<8x128xf32>
    %254 = arith.addf %253, %252 : vector<8x128xf32>
    %255 = arith.divf %253, %254 : vector<8x128xf32>
    %256 = vector.extract_strided_slice %243 {offsets = [0, 256], sizes = [8, 128], strides = [1, 1]} : vector<8x512xf32> to vector<8x128xf32>
    %257 = math.tanh %256 : vector<8x128xf32>
    %258 = vector.extract_strided_slice %243 {offsets = [0, 384], sizes = [8, 128], strides = [1, 1]} : vector<8x512xf32> to vector<8x128xf32>
    %259 = arith.negf %258 : vector<8x128xf32>
    %260 = math.exp %259 : vector<8x128xf32>
    %cst_61 = arith.constant 1.000000e+00 : f32
    %261 = vector.broadcast %cst_61 : f32 to vector<8x128xf32>
    %262 = arith.addf %261, %260 : vector<8x128xf32>
    %263 = arith.divf %261, %262 : vector<8x128xf32>
    %264 = arith.mulf %255, %234 : vector<8x128xf32>
    %265 = arith.mulf %249, %257 : vector<8x128xf32>
    %266 = arith.addf %264, %265 : vector<8x128xf32>
    %267 = math.tanh %266 : vector<8x128xf32>
    %268 = arith.mulf %263, %267 : vector<8x128xf32>
    %c8_i32_62 = arith.constant 8 : i32
    %c0_63 = arith.constant 0 : index
    %c0_64 = arith.constant 0 : index
    %269 = vector.load %arg6[%c0_63, %c0_64] : memref<8x128xf32, #tpu.memory_space<vmem>>, vector<8x128xf32>
    tpu.vector_store %arg6[%c0_63, %c0_64], %268 {strides = array<i32>} : memref<8x128xf32, #tpu.memory_space<vmem>>, vector<8x128xf32>,
    %c0_65 = arith.constant 0 : index
    %c0_66 = arith.constant 0 : index
    %270 = vector.load %arg7[%c0_65, %c0_66] : memref<8x128xf32, #tpu.memory_space<vmem>>, vector<8x128xf32>
    tpu.vector_store %arg7[%c0_65, %c0_66], %266 {strides = array<i32>} : memref<8x128xf32, #tpu.memory_space<vmem>>, vector<8x128xf32>,
    %c0_i32_67 = arith.constant 0 : i32
    %271 = arith.cmpi eq, %arg0, %c0_i32_67 : i32
    %272 = arith.extui %271 : i1 to i32
    %c0_i32_68 = arith.constant 0 : i32
    %273 = arith.cmpi ne, %272, %c0_i32_68 : i32
    scf.if %273 {
      %c0_69 = arith.constant 0 : index
      %c0_70 = arith.constant 0 : index
      %274 = vector.load %arg5[%c0_69, %c0_70] : memref<8x128xf32, #tpu.memory_space<vmem>>, vector<8x128xf32>
      tpu.vector_store %arg5[%c0_69, %c0_70], %268 {strides = array<i32>} : memref<8x128xf32, #tpu.memory_space<vmem>>, vector<8x128xf32>,
    } else {
    }
    return
  }
  func.func @transform_0(%arg0: i32) -> (i32, i32) {
    %c0_i32 = arith.constant 0 : i32
    %c0_i32_0 = arith.constant 0 : i32
    return %arg0, %c0_i32 : i32, i32
  }
  func.func @transform_1(%arg0: i32) -> (i32, i32) {
    %c0_i32 = arith.constant 0 : i32
    %c0_i32_0 = arith.constant 0 : i32
    %c0_i32_1 = arith.constant 0 : i32
    return %c0_i32, %c0_i32_0 : i32, i32
  }
  func.func @transform_2(%arg0: i32) -> (i32, i32) {
    %c0_i32 = arith.constant 0 : i32
    %c0_i32_0 = arith.constant 0 : i32
    %c0_i32_1 = arith.constant 0 : i32
    return %c0_i32, %c0_i32_0 : i32, i32
  }
  func.func @transform_3(%arg0: i32) -> (i32, i32) {
    %c0_i32 = arith.constant 0 : i32
    %c0_i32_0 = arith.constant 0 : i32
    %c0_i32_1 = arith.constant 0 : i32
    return %c0_i32, %c0_i32_0 : i32, i32
  }
  func.func @transform_4(%arg0: i32) -> (i32, i32) {
    %c0_i32 = arith.constant 0 : i32
    %c0_i32_0 = arith.constant 0 : i32
    %c0_i32_1 = arith.constant 0 : i32
    return %c0_i32, %c0_i32_0 : i32, i32
  }
}

</mosaic_0001>

<bundles_post_ra>
// kernel: temporal_model_forward.1
= control target key start
LH: loop header
LB: loop body
LE: loop exit
PB: predicated region body
PF: predicated region fallthrough
CT: control target
= control target key end

     0   :  { %v2807_v1 = vmov 0   ;;  %s2802_s1 = inlined_call_operand.vmem [shape: bf16[128,512], index: 1, kind: input, shape index: {}]   ;;  %s2803_s0 = inlined_call_operand.vmem [shape: bf16[64,128], index: 0, kind: input, shape index: {}]   ;;  %s2804_s2 = inlined_call_operand.vmem [shape: bf16[128,512], index: 2, kind: input, shape index: {}]   ;;  %s2805_s3 = inlined_call_operand.vmem [shape: f32[1,512], index: 3, kind: input, shape index: {}]   ;;  %s2806_s4 = inlined_call_operand.vmem [shape: f32[8,128], index: 4, kind: output, shape index: {}]  }
   0x1   :  { %v1697_v0 = vld [vmem:[%s2802_s1 + $0xe4] ss:$16 sps:$4 sm:$0xff]   ;;  %302 = vmatprep.mubr.bf16.mxu0 %v2807_v1  ;;  %375 = vmatprep.mubr.bf16.mxu1 %v2807_v1  ;;  %v1699_v2 = vld [vmem:[%s2802_s1 + $0xec] ss:$16 sps:$4 sm:$0xff]   ;;  %v1701_v3 = vld [vmem:[%s2802_s1 + $0xe0] ss:$16 sps:$4 sm:$0xff]  }
   0x2   :  { %270 = vmatprep.subr.bf16.mxu0 %v1697_v0  ;;  %v1702_v4 = vld [vmem:[%s2802_s1 + $0xe8] ss:$16 sps:$4 sm:$0xff]   ;;  %343 = vmatprep.subr.bf16.mxu1 %v1699_v2  ;;  %v1703_v5 = vld [vmem:[%s2802_s1 + $0xc4] ss:$16 sps:$4 sm:$0xff]   ;;  %v1705_v6 = vld [vmem:[%s2802_s1 + $0xcc] ss:$16 sps:$4 sm:$0xff]  }
   0x3   :  { %271 = vmatpush1.bf16.msra.mxu0 %v1701_v3  ;;  %344 = vmatpush1.bf16.msra.mxu1 %v1702_v4  ;;  %v1707_v7 = vld [vmem:[%s2802_s1 + $0xc0] ss:$16 sps:$4 sm:$0xff]   ;;  %v1708_v8 = vld [vmem:[%s2802_s1 + $0xc8] ss:$16 sps:$4 sm:$0xff]   ;;  %v1709_v9 = vld [vmem:[%s2802_s1 + $0xa4] ss:$16 sps:$4 sm:$0xff]  }
   0x4   :  { %272 = vmatprep.subr.bf16.mxu0 %v1703_v5  ;;  %345 = vmatprep.subr.bf16.mxu1 %v1705_v6  ;;  %v1711_v10 = vld [vmem:[%s2802_s1 + $0xac] ss:$16 sps:$4 sm:$0xff]   ;;  %v1713_v11 = vld [vmem:[%s2802_s1 + $0xa0] ss:$16 sps:$4 sm:$0xff]   ;;  %v1714_v12 = vld [vmem:[%s2802_s1 + $0xa8] ss:$16 sps:$4 sm:$0xff]  }
   0x5   :  { %v1715_v13 = vld [vmem:[%s2802_s1 + $0x84] ss:$16 sps:$4 sm:$0xff]   ;;  %v1717_v14 = vld [vmem:[%s2802_s1 + $0x8c] ss:$16 sps:$4 sm:$0xff]   ;;  %v1719_v15 = vld [vmem:[%s2802_s1 + $0x80] ss:$16 sps:$4 sm:$0xff]  }
   0x6   :  { %v1720_v16 = vld [vmem:[%s2802_s1 + $0x88] ss:$16 sps:$4 sm:$0xff]   ;;  %v1721_v17 = vld [vmem:[%s2802_s1 + $0x64] ss:$16 sps:$4 sm:$0xff]   ;;  %v1723_v18 = vld [vmem:[%s2802_s1 + $0x6c] ss:$16 sps:$4 sm:$0xff]  }
   0x7   :  { %273 = vmatpush1.bf16.msra.mxu0 %v1707_v7  ;;  %346 = vmatpush1.bf16.msra.mxu1 %v1708_v8  ;;  %v1725_v19 = vld [vmem:[%s2802_s1 + $0x60] ss:$16 sps:$4 sm:$0xff]   ;;  %v1726_v20 = vld [vmem:[%s2802_s1 + $0x68] ss:$16 sps:$4 sm:$0xff]   ;;  %v1727_v21 = vld [vmem:[%s2802_s1 + $0x44] ss:$16 sps:$4 sm:$0xff]   ;;  %v66_v7 = vlaneseq }
   0x8   :  { %274 = vmatprep.subr.bf16.mxu0 %v1709_v9  ;;  %347 = vmatprep.subr.bf16.mxu1 %v1711_v10  ;;  %v1729_v22 = vld [vmem:[%s2802_s1 + $0x4c] ss:$16 sps:$4 sm:$0xff]   ;;  %v1731_v23 = vld [vmem:[%s2802_s1 + $0x40] ss:$16 sps:$4 sm:$0xff]   ;;  %v1732_v24 = vld [vmem:[%s2802_s1 + $0x48] ss:$16 sps:$4 sm:$0xff]  }
   0x9   :  { %v1733_v25 = vld [vmem:[%s2802_s1 + $0x24] ss:$16 sps:$4 sm:$0xff]   ;;  %v1735_v26 = vld [vmem:[%s2802_s1 + $0x2c] ss:$16 sps:$4 sm:$0xff]   ;;  %v1737_v27 = vld [vmem:[%s2802_s1 + $0x20] ss:$16 sps:$4 sm:$0xff]  }
   0xa   :  { %v1738_v28 = vld [vmem:[%s2802_s1 + $0x28] ss:$16 sps:$4 sm:$0xff]   ;;  %v1739_v29 = vld [vmem:[%s2802_s1 + $0x4] ss:$16 sps:$4 sm:$0xff]   ;;  %v1741_v30 = vld [vmem:[%s2802_s1 + $0xc] ss:$16 sps:$4 sm:$0xff]  }
   0xb   :  { %275 = vmatpush1.bf16.msra.mxu0 %v1713_v11  ;;  %348 = vmatpush1.bf16.msra.mxu1 %v1714_v12  ;;  %v1743_v31 = vld [vmem:[%s2802_s1] ss:$16 sps:$4 sm:$0xff]   ;;  %v1744_v32 = vld [vmem:[%s2802_s1 + $0x8] ss:$16 sps:$4 sm:$0xff]   ;;  %v2085_v33 = vld [vmem:[%s2804_s2 + $0xe4] ss:$16 sps:$4 sm:$0xff]  }
   0xc   :  { %276 = vmatprep.subr.bf16.mxu0 %v1715_v13  ;;  %349 = vmatprep.subr.bf16.mxu1 %v1717_v14  ;;  %v2090_v34 = vld [vmem:[%s2804_s2 + $0xec] ss:$16 sps:$4 sm:$0xff]   ;;  %v1745_v35 = vld [vmem:[%s2803_s0] sm:$0xff]   ;;  %v2103_v37 = vld [vmem:[%s2804_s2 + $0xe8] ss:$16 sps:$4 sm:$0xff]   ;;  %v1958_v6 = vmov 0.0|0.0  }
   0xd   :  { %v2098_v36 = vld [vmem:[%s2804_s2 + $0xe0] ss:$16 sps:$4 sm:$0xff]   ;;  %v2110_v38 = vld [vmem:[%s2804_s2 + $0xc4] ss:$16 sps:$4 sm:$0xff]   ;;  %v2115_v39 = vld [vmem:[%s2804_s2 + $0xcc] ss:$16 sps:$4 sm:$0xff]  }
   0xe   :  { %v2120_v40 = vld [vmem:[%s2804_s2 + $0xc0] ss:$16 sps:$4 sm:$0xff]   ;;  %v2127_v41 = vld [vmem:[%s2804_s2 + $0xc8] ss:$16 sps:$4 sm:$0xff]   ;;  %v2134_v42 = vld [vmem:[%s2804_s2 + $0xa4] ss:$16 sps:$4 sm:$0xff]  }
   0xf   :  { %277 = vmatpush1.bf16.msra.mxu0 %v1719_v15  ;;  %350 = vmatpush1.bf16.msra.mxu1 %v1720_v16  ;;  %v2139_v43 = vld [vmem:[%s2804_s2 + $0xac] ss:$16 sps:$4 sm:$0xff]   ;;  %v2149_v45 = vld [vmem:[%s2804_s2 + $0xa0] ss:$16 sps:$4 sm:$0xff]   ;;  %v2154_v46 = vld [vmem:[%s2804_s2 + $0xa8] ss:$16 sps:$4 sm:$0xff]  }
  0x10   :  { %278 = vmatprep.subr.bf16.mxu0 %v1721_v17  ;;  %351 = vmatprep.subr.bf16.mxu1 %v1723_v18  ;;  %v1758_v44 = vld [vmem:[%s2803_s0 + $0x8] sm:$0xff]   ;;  %v2161_v47 = vld [vmem:[%s2804_s2 + $0x84] ss:$16 sps:$4 sm:$0xff]   ;;  %v2173_v49 = vld [vmem:[%s2804_s2 + $0x80] ss:$16 sps:$4 sm:$0xff]   ;;  %v67_v8 = vshrl.u32 %v66_v7, 7 }
  0x11   :  { %v2168_v48 = vld [vmem:[%s2804_s2 + $0x8c] ss:$16 sps:$4 sm:$0xff]   ;;  %v2178_v50 = vld [vmem:[%s2804_s2 + $0x88] ss:$16 sps:$4 sm:$0xff]   ;;  %v2185_v51 = vld [vmem:[%s2804_s2 + $0x64] ss:$16 sps:$4 sm:$0xff]  }
  0x12   :  { %v2192_v52 = vld [vmem:[%s2804_s2 + $0x6c] ss:$16 sps:$4 sm:$0xff]   ;;  %v1771_v53 = vld [vmem:[%s2803_s0 + $0x10] sm:$0xff]   ;;  %v2209_v55 = vld [vmem:[%s2804_s2 + $0x68] ss:$16 sps:$4 sm:$0xff]   ;;  %v76_v9 = vsub.s32 2, %v67_v8 }
  0x13   :  { %279 = vmatpush1.bf16.msra.mxu0 %v1725_v19  ;;  %352 = vmatpush1.bf16.msra.mxu1 %v1726_v20  ;;  %v2204_v54 = vld [vmem:[%s2804_s2 + $0x60] ss:$16 sps:$4 sm:$0xff]   ;;  %v2216_v56 = vld [vmem:[%s2804_s2 + $0x44] ss:$16 sps:$4 sm:$0xff]   ;;  %v2221_v57 = vld [vmem:[%s2804_s2 + $0x4c] ss:$16 sps:$4 sm:$0xff]  }
  0x14   :  { %280 = vmatprep.subr.bf16.mxu0 %v1727_v21  ;;  %353 = vmatprep.subr.bf16.mxu1 %v1729_v22  ;;  %v2228_v58 = vld [vmem:[%s2804_s2 + $0x40] ss:$16 sps:$4 sm:$0xff]   ;;  %v2233_v59 = vld [vmem:[%s2804_s2 + $0x48] ss:$16 sps:$4 sm:$0xff]   ;;  %v2240_v60 = vld [vmem:[%s2804_s2 + $0x24] ss:$16 sps:$4 sm:$0xff]  }
  0x15   :  { %v2245_v61 = vld [vmem:[%s2804_s2 + $0x2c] ss:$16 sps:$4 sm:$0xff]   ;;  %v2257_v63 = vld [vmem:[%s2804_s2 + $0x20] ss:$16 sps:$4 sm:$0xff]   ;;  %v2262_v0 = vld [vmem:[%s2804_s2 + $0x28] ss:$16 sps:$4 sm:$0xff]  }
  0x16   :  { %v1784_v62 = vld [vmem:[%s2803_s0 + $0x18] sm:$0xff]   ;;  %v2269_v2 = vld [vmem:[%s2804_s2 + $0x4] ss:$16 sps:$4 sm:$0xff]   ;;  %v2281_v4 = vld [vmem:[%s2804_s2] ss:$16 sps:$4 sm:$0xff]   ;;  %v68_v10 = vsub.s32 0, %v67_v8 }
  0x17   :  { %281 = vmatpush1.bf16.msra.mxu0 %v1731_v23  ;;  %354 = vmatpush1.bf16.msra.mxu1 %v1732_v24  ;;  %v2274_v3 = vld [vmem:[%s2804_s2 + $0xc] ss:$16 sps:$4 sm:$0xff]   ;;  %v2286_v5 = vld [vmem:[%s2804_s2 + $0x8] ss:$16 sps:$4 sm:$0xff]   ;;  %v80_v11 = vsub.s32 3, %v67_v8  ;;  %v72_v16 = vsub.s32 1, %v67_v8 }
  0x18   :  { %282 = vmatprep.subr.bf16.mxu0 %v1733_v25  ;;  %355 = vmatprep.subr.bf16.mxu1 %v1735_v26  ;;  %v64_v12 = vld [vmem:[%s2805_s3] sm:$0xf] }
  0x19   :  { %v2337_v15 = vrot.slane %v64_v12, %v76_v9  ;;  %v69_v19 = vrot.slane %v64_v12, %v68_v10  ;;  %v2343_v20 = vrot.slane %v64_v12, %v80_v11  ;;  %v73_v23 = vrot.slane %v64_v12, %v72_v16 }
  0x1b   :  { %283 = vmatpush1.bf16.msra.mxu0 %v1737_v27  ;;  %356 = vmatpush1.bf16.msra.mxu1 %v1738_v28 }
  0x1c   :  { %284 = vmatprep.subr.bf16.mxu0 %v1739_v29  ;;  %357 = vmatprep.subr.bf16.mxu1 %v1741_v30 }
  0x1f   :  { %285 = vmatpush1.bf16.msra.mxu0 %v1743_v31  ;;  %358 = vmatpush1.bf16.msra.mxu1 %v1744_v32 }
  0x20   :  { %650 = vmatprep.subr.bf16.mxu0 %v2085_v33  ;;  %691 = vmatprep.subr.bf16.mxu1 %v2090_v34 }
  0x22   :  { %303 = vmatmul.mubr.bf16.vlgmr.msra.gmra.mxu0 %v1745_v35  ;;  %376 = vmatmul.mubr.bf16.vlgmr.msra.gmra.mxu1 %v1745_v35 }
  0x23   :  { %651 = vmatpush1.bf16.msra.mxu0 %v2098_v36  ;;  %692 = vmatpush1.bf16.msra.mxu1 %v2103_v37 }
  0x24   :  { %652 = vmatprep.subr.bf16.mxu0 %v2110_v38  ;;  %693 = vmatprep.subr.bf16.mxu1 %v2115_v39 }
  0x25   :  { %312 = vmatprep.mubr.bf16.mxu0 %v2807_v1  ;;  %385 = vmatprep.mubr.bf16.mxu1 %v2807_v1 }
  0x27   :  { %653 = vmatpush1.bf16.msra.mxu0 %v2120_v40  ;;  %694 = vmatpush1.bf16.msra.mxu1 %v2127_v41 }
  0x28   :  { %654 = vmatprep.subr.bf16.mxu0 %v2134_v42  ;;  %695 = vmatprep.subr.bf16.mxu1 %v2139_v43 }
  0x2a   :  { %313 = vmatmul.mubr.bf16.gmra.mxu0 %v1758_v44  ;;  %386 = vmatmul.mubr.bf16.gmra.mxu1 %v1758_v44 }
  0x2b   :  { %655 = vmatpush1.bf16.msra.mxu0 %v2149_v45  ;;  %696 = vmatpush1.bf16.msra.mxu1 %v2154_v46 }
  0x2c   :  { %656 = vmatprep.subr.bf16.mxu0 %v2161_v47  ;;  %697 = vmatprep.subr.bf16.mxu1 %v2168_v48 }
  0x2d   :  { %322 = vmatprep.mubr.bf16.mxu0 %v2807_v1  ;;  %395 = vmatprep.mubr.bf16.mxu1 %v2807_v1 }
  0x2f   :  { %657 = vmatpush1.bf16.msra.mxu0 %v2173_v49  ;;  %698 = vmatpush1.bf16.msra.mxu1 %v2178_v50 }
  0x30   :  { %658 = vmatprep.subr.bf16.mxu0 %v2185_v51  ;;  %699 = vmatprep.subr.bf16.mxu1 %v2192_v52 }
  0x32   :  { %323 = vmatmul.mubr.bf16.gmra.mxu0 %v1771_v53  ;;  %396 = vmatmul.mubr.bf16.gmra.mxu1 %v1771_v53 }
  0x33   :  { %659 = vmatpush1.bf16.msra.mxu0 %v2204_v54  ;;  %700 = vmatpush1.bf16.msra.mxu1 %v2209_v55 }
  0x34   :  { %660 = vmatprep.subr.bf16.mxu0 %v2216_v56  ;;  %701 = vmatprep.subr.bf16.mxu1 %v2221_v57 }
  0x35   :  { %332 = vmatprep.mubr.bf16.mxu0 %v2807_v1  ;;  %405 = vmatprep.mubr.bf16.mxu1 %v2807_v1 }
  0x37   :  { %661 = vmatpush1.bf16.msra.mxu0 %v2228_v58  ;;  %702 = vmatpush1.bf16.msra.mxu1 %v2233_v59 }
  0x38   :  { %662 = vmatprep.subr.bf16.mxu0 %v2240_v60  ;;  %703 = vmatprep.subr.bf16.mxu1 %v2245_v61 }
  0x3a   :  { %333 = vmatmul.mubr.bf16.gmra.mxu0 %v1784_v62  ;;  %406 = vmatmul.mubr.bf16.gmra.mxu1 %v1784_v62 }
  0x3b   :  { %663 = vmatpush1.bf16.msra.mxu0 %v2257_v63  ;;  %704 = vmatpush1.bf16.msra.mxu1 %v2262_v0 }
  0x3c   :  { %664 = vmatprep.subr.bf16.mxu0 %v2269_v2  ;;  %705 = vmatprep.subr.bf16.mxu1 %v2274_v3 }
  0x3d   :  { %682 = vmatprep.mubr.bf16.mxu0 %v2807_v1  ;;  %723 = vmatprep.mubr.bf16.mxu1 %v2807_v1 }
  0x3f   :  { %665 = vmatpush1.bf16.msra.mxu0 %v2281_v4  ;;  %706 = vmatpush1.bf16.msra.mxu1 %v2286_v5 }
  0x40   :  { %768 = vmatprep.subr.bf16.mxu0 %v2085_v33  ;;  %809 = vmatprep.subr.bf16.mxu1 %v2090_v34 }
  0x42   :  { %683 = vmatmul.mubr.bf16.vlgmr.msra.gmra.mxu0 %v1958_v6  ;;  %724 = vmatmul.mubr.bf16.vlgmr.msra.gmra.mxu1 %v1958_v6 }
  0x43   :  { %769 = vmatpush1.bf16.msra.mxu0 %v2098_v36  ;;  %810 = vmatpush1.bf16.msra.mxu1 %v2103_v37 }
  0x44   :  { %770 = vmatprep.subr.bf16.mxu0 %v2110_v38  ;;  %811 = vmatprep.subr.bf16.mxu1 %v2115_v39 }
  0x45   :  { %800 = vmatprep.mubr.bf16.mxu0 %v2807_v1  ;;  %841 = vmatprep.mubr.bf16.mxu1 %v2807_v1 }
  0x47   :  { %771 = vmatpush1.bf16.msra.mxu0 %v2120_v40  ;;  %812 = vmatpush1.bf16.msra.mxu1 %v2127_v41 }
  0x48   :  { %772 = vmatprep.subr.bf16.mxu0 %v2134_v42  ;;  %813 = vmatprep.subr.bf16.mxu1 %v2139_v43 }
  0x4b   :  { %773 = vmatpush1.bf16.msra.mxu0 %v2149_v45  ;;  %814 = vmatpush1.bf16.msra.mxu1 %v2154_v46 }
  0x4c   :  { %774 = vmatprep.subr.bf16.mxu0 %v2161_v47  ;;  %815 = vmatprep.subr.bf16.mxu1 %v2168_v48 }
  0x4f   :  { %775 = vmatpush1.bf16.msra.mxu0 %v2173_v49  ;;  %816 = vmatpush1.bf16.msra.mxu1 %v2178_v50 }
  0x50   :  { %776 = vmatprep.subr.bf16.mxu0 %v2185_v51  ;;  %817 = vmatprep.subr.bf16.mxu1 %v2192_v52 }
  0x53   :  { %777 = vmatpush1.bf16.msra.mxu0 %v2204_v54  ;;  %818 = vmatpush1.bf16.msra.mxu1 %v2209_v55 }
  0x54   :  { %778 = vmatprep.subr.bf16.mxu0 %v2216_v56  ;;  %819 = vmatprep.subr.bf16.mxu1 %v2221_v57 }
  0x57   :  { %779 = vmatpush1.bf16.msra.mxu0 %v2228_v58  ;;  %820 = vmatpush1.bf16.msra.mxu1 %v2233_v59 }
  0x58   :  { %780 = vmatprep.subr.bf16.mxu0 %v2240_v60  ;;  %821 = vmatprep.subr.bf16.mxu1 %v2245_v61 }
  0x5b   :  { %781 = vmatpush1.bf16.msra.mxu0 %v2257_v63  ;;  %822 = vmatpush1.bf16.msra.mxu1 %v2262_v0 }
  0x5c   :  { %782 = vmatprep.subr.bf16.mxu0 %v2269_v2  ;;  %823 = vmatprep.subr.bf16.mxu1 %v2274_v3 }
  0x5f   :  { %783 = vmatpush1.bf16.msra.mxu0 %v2281_v4  ;;  %824 = vmatpush1.bf16.msra.mxu1 %v2286_v5 }
  0x60   :  { %886 = vmatprep.subr.bf16.mxu0 %v2085_v33  ;;  %927 = vmatprep.subr.bf16.mxu1 %v2090_v34 }
  0xe2   :  { %v2333_v13 = vpop.f32.mrf.mxu0  ;;  %v2335_v14 = vpop.f32.mrf.mxu1 }
  0xe4   :  { %v2339_v17 = vpop.f32.mrf.mxu0  ;;  %v2341_v18 = vpop.f32.mrf.mxu1 }
  0xe6   :  { %v308_v21 = vpop.f32.mrf.mxu0  ;;  %v381_v22 = vpop.f32.mrf.mxu1 }
  0xe7   :  { %v2345_v24 = vadd.f32 %v308_v21, %v69_v19  ;;  %v2348_v25 = vadd.f32 %v381_v22, %v2337_v15 }
  0xe8   :  { %v310_v26 = vpop.f32.mrf.mxu0  ;;  %v383_v27 = vpop.f32.mrf.mxu1 }
  0xe9   :  { %v2350_v28 = vadd.f32 %v310_v26, %v73_v23  ;;  %v2353_v29 = vadd.f32 %v383_v27, %v2343_v20 }
  0xea   :  { %v314_v30 = vpop.f32.mrf.mxu0  ;;  %v387_v31 = vpop.f32.mrf.mxu1 }
  0xeb   :  { %v2355_v32 = vadd.f32 %v314_v30, %v69_v19  ;;  %v2358_v35 = vadd.f32 %v387_v31, %v2337_v15 }
  0xec   :  { %v316_v44 = vpop.f32.mrf.mxu0  ;;  %v389_v53 = vpop.f32.mrf.mxu1 }
  0xed   :  { %2809 = vst [vmem:[#allocation5_spill] sm:$0xff] %v2358_v35  ;;  %v2360_v62 = vadd.f32 %v316_v44, %v73_v23  ;;  %v2363_v6 = vadd.f32 %v389_v53, %v2343_v20 }
  0xee   :  { %v318_v7 = vpop.f32.mrf.mxu0  ;;  %v391_v8 = vpop.f32.mrf.mxu1 }
  0xef   :  { %v2365_v9 = vadd.f32 %v318_v7, %v69_v19  ;;  %v2368_v10 = vadd.f32 %v391_v8, %v2337_v15 }
  0xf0   :  { %v320_v11 = vpop.f32.mrf.mxu0  ;;  %v393_v12 = vpop.f32.mrf.mxu1 }
  0xf1   :  { %2810 = vst [vmem:[#allocation6_spill] sm:$0xff] %v2365_v9  ;;  %2811 = vst [vmem:[#allocation7_spill] sm:$0xff] %v2368_v10  ;;  %v2370_v16 = vadd.f32 %v320_v11, %v73_v23  ;;  %v2373_v21 = vadd.f32 %v393_v12, %v2343_v20 }
  0xf2   :  { %v324_v22 = vpop.f32.mrf.mxu0  ;;  %v397_v26 = vpop.f32.mrf.mxu1 }
  0xf3   :  { %2812 = vst [vmem:[#allocation8_spill] sm:$0xff] %v2370_v16  ;;  %2813 = vst [vmem:[#allocation9_spill] sm:$0xff] %v2373_v21  ;;  %v2375_v27 = vadd.f32 %v324_v22, %v69_v19  ;;  %v2378_v30 = vadd.f32 %v397_v26, %v2337_v15 }
  0xf4   :  { %v326_v31 = vpop.f32.mrf.mxu0  ;;  %v399_v44 = vpop.f32.mrf.mxu1 }
  0xf5   :  { %2814 = vst [vmem:[#allocation10_spill] sm:$0xff] %v2375_v27  ;;  %2815 = vst [vmem:[#allocation11_spill] sm:$0xff] %v2378_v30  ;;  %v2380_v53 = vadd.f32 %v326_v31, %v73_v23  ;;  %v2383_v7 = vadd.f32 %v399_v44, %v2343_v20 }
  0xf6   :  { %v328_v8 = vpop.f32.mrf.mxu0  ;;  %v401_v11 = vpop.f32.mrf.mxu1 }
  0xf7   :  { %2816 = vst [vmem:[#allocation12_spill] sm:$0xff] %v2380_v53  ;;  %2817 = vst [vmem:[#allocation13_spill] sm:$0xff] %v2383_v7  ;;  %v2385_v1 = vadd.f32 %v328_v8, %v69_v19  ;;  %v2388_v12 = vadd.f32 %v401_v11, %v2337_v15 }
  0xf8   :  { %v330_v10 = vpop.f32.mrf.mxu0  ;;  %v403_v22 = vpop.f32.mrf.mxu1 }
  0xf9   :  { %2818 = vst [vmem:[#allocation14_spill] sm:$0xff] %v2385_v1  ;;  %2819 = vst [vmem:[#allocation15_spill] sm:$0xff] %v2388_v12  ;;  %v2390_v27 = vadd.f32 %v330_v10, %v73_v23  ;;  %v2393_v26 = vadd.f32 %v403_v22, %v2343_v20 }
  0xfa   :  { %v334_v30 = vpop.f32.mrf.mxu0  ;;  %v407_v31 = vpop.f32.mrf.mxu1 }
  0xfb   :  { %2820 = vst [vmem:[#allocation16_spill] sm:$0xff] %v2390_v27  ;;  %2821 = vst [vmem:[#allocation17_spill] sm:$0xff] %v2393_v26  ;;  %v2395_v53 = vadd.f32 %v334_v30, %v69_v19  ;;  %v2398_v44 = vadd.f32 %v407_v31, %v2337_v15 }
  0xfc   :  { %v336_v7 = vpop.f32.mrf.mxu0  ;;  %v409_v8 = vpop.f32.mrf.mxu1 }
  0xfd   :  { %2822 = vst [vmem:[#allocation18_spill] sm:$0xff] %v2395_v53  ;;  %2823 = vst [vmem:[#allocation19_spill] sm:$0xff] %v2398_v44  ;;  %v2400_v1 = vadd.f32 %v336_v7, %v73_v23  ;;  %v2403_v11 = vadd.f32 %v409_v8, %v2343_v20  ;;  %v305_v53 = vadd.f32 %v2333_v13, %v69_v19 }
  0xfe   :  { %v338_v12 = vpop.f32.mrf.mxu0  ;;  %v411_v10 = vpop.f32.mrf.mxu1  ;;  %v307_v8 = vadd.f32 %v2339_v17, %v73_v23 }
  0xff   :  { %2824 = vst [vmem:[#allocation20_spill] sm:$0xff] %v2400_v1  ;;  %2825 = vst [vmem:[#allocation21_spill] sm:$0xff] %v2403_v11  ;;  %v2405_v27 = vadd.f32 %v338_v12, %v69_v19  ;;  %v2408_v22 = vadd.f32 %v411_v10, %v2337_v15  ;;  %v380_v19 = vadd.f32 %v2341_v18, %v2343_v20 }
 0x100   :  { %v340_v26 = vpop.f32.mrf.mxu0  ;;  %v413_v30 = vpop.f32.mrf.mxu1 }
 0x101   :  { %2826 = vst [vmem:[#allocation22_spill] sm:$0xff] %v2405_v27  ;;  %2827 = vst [vmem:[#allocation23_spill] sm:$0xff] %v2408_v22  ;;  %v2411_v31 = vadd.f32 %v340_v26, %v73_v23  ;;  %v2414_v44 = vadd.f32 %v413_v30, %v2343_v20  ;;  %v378_v30 = vadd.f32 %v2335_v14, %v2337_v15 }
 0x102   :  { %v684_v7 = vpop.f32.mrf.mxu0  ;;  %v725_v1 = vpop.f32.mrf.mxu1 }
 0x103   :  { %v732_v11 = vadd.f32 %v684_v7, %v305_v53  ;;  %v734_v53 = vadd.f32 %v725_v1, %v378_v30 }
 0x104   :  { %v686_v21 = vpop.f32.mrf.mxu0  ;;  %v727_v12 = vpop.f32.mrf.mxu1 }
 0x105   :  { %v1671_v27 = vmul.f32 -1.442695, %v732_v11  ;;  %v733_v16 = vadd.f32 %v686_v21, %v307_v8  ;;  %v735_v26 = vadd.f32 %v727_v12, %v380_v19 }
 0x106   :  { %v688_v10 = vpop.f32.mrf.mxu0  ;;  %v729_v22 = vpop.f32.mrf.mxu1 }
 0x107   :  { %1797 = vpow2.f32 %v1671_v27  ;;  %v1672_v9 = vmul.f32 -1.442695, %v733_v16  ;;  %v1673_v17 = vmul.f32 -1.442695, %v735_v26  ;;  %v2828_v10 = vmov 0  }
 0x108   :  { %v689_v35 = vpop.f32.mrf.mxu0  ;;  %v730_v13 = vpop.f32.mrf.mxu1 }
 0x109   :  { %1799 = vpow2.f32 %v1672_v9 }
 0x10a   :  { %1801 = vpow2.f32 %v1673_v17 }
 0x114   :  { %v1798_v23 = vpop.eup %1797 }
 0x115   :  { %v739_v7 = vadd.f32 1.0, %v1798_v23 }
 0x116   :  { %v1800_v11 = vpop.eup %1799 }
 0x117   :  { %1803 = vrcp.f32 %v739_v7  ;;  %v745_v21 = vadd.f32 1.0, %v1800_v11  ;;  %v1802_v35 = vpop.eup %1801 }
 0x118   :  { %1805 = vtanh.f32 %v734_v53  ;;  %v752_v22 = vadd.f32 1.0, %v1802_v35 }
 0x119   :  { %1807 = vrcp.f32 %v745_v21 }
 0x11a   :  { %1809 = vrcp.f32 %v752_v22 }
 0x124   :  { %v1804_v16 = vpop.eup %1803 }
 0x125   :  { %v1806_v9 = vpop.eup %1805 }
 0x126   :  { %v1808_v27 = vpop.eup %1807  ;;  %v756_v20 = vmul.f32 %v1806_v9, %v1804_v16 }
 0x127   :  { %v755_v18 = vmul.f32 0.0, %v1808_v27  ;;  %v1810_v1 = vpop.eup %1809 }
 0x129   :  { %v2421_v8 = vadd.f32 %v756_v20, %v755_v18 }
 0x12b   :  { %1811 = vtanh.f32 %v2421_v8 }
 0x138   :  { %v1812_v14 = vpop.eup %1811 }
 0x139   :  { %v759_v15 = vmul.f32 %v1812_v14, %v1810_v1 }
 0x13b   :  { %v767_v12 = vpack.c.bf16 %v759_v15, %v759_v15 }
 0x13d   :  { %801 = vmatmul.mubr.bf16.vlgmr.msra.gmra.mxu0 %v767_v12  ;;  %842 = vmatmul.mubr.bf16.vlgmr.msra.gmra.mxu1 %v767_v12 }
 0x13e   :  { %887 = vmatpush1.bf16.msra.mxu0 %v2098_v36  ;;  %928 = vmatpush1.bf16.msra.mxu1 %v2103_v37 }
 0x13f   :  { %888 = vmatprep.subr.bf16.mxu0 %v2110_v38  ;;  %929 = vmatprep.subr.bf16.mxu1 %v2115_v39 }
 0x140   :  { %918 = vmatprep.mubr.bf16.mxu0 %v2828_v10  ;;  %959 = vmatprep.mubr.bf16.mxu1 %v2828_v10 }
 0x142   :  { %889 = vmatpush1.bf16.msra.mxu0 %v2120_v40  ;;  %930 = vmatpush1.bf16.msra.mxu1 %v2127_v41 }
 0x143   :  { %890 = vmatprep.subr.bf16.mxu0 %v2134_v42  ;;  %931 = vmatprep.subr.bf16.mxu1 %v2139_v43 }
 0x146   :  { %891 = vmatpush1.bf16.msra.mxu0 %v2149_v45  ;;  %932 = vmatpush1.bf16.msra.mxu1 %v2154_v46 }
 0x147   :  { %892 = vmatprep.subr.bf16.mxu0 %v2161_v47  ;;  %933 = vmatprep.subr.bf16.mxu1 %v2168_v48 }
 0x14a   :  { %893 = vmatpush1.bf16.msra.mxu0 %v2173_v49  ;;  %934 = vmatpush1.bf16.msra.mxu1 %v2178_v50 }
 0x14b   :  { %894 = vmatprep.subr.bf16.mxu0 %v2185_v51  ;;  %935 = vmatprep.subr.bf16.mxu1 %v2192_v52 }
 0x14e   :  { %895 = vmatpush1.bf16.msra.mxu0 %v2204_v54  ;;  %936 = vmatpush1.bf16.msra.mxu1 %v2209_v55 }
 0x14f   :  { %896 = vmatprep.subr.bf16.mxu0 %v2216_v56  ;;  %937 = vmatprep.subr.bf16.mxu1 %v2221_v57 }
 0x152   :  { %897 = vmatpush1.bf16.msra.mxu0 %v2228_v58  ;;  %938 = vmatpush1.bf16.msra.mxu1 %v2233_v59 }
 0x153   :  { %898 = vmatprep.subr.bf16.mxu0 %v2240_v60  ;;  %939 = vmatprep.subr.bf16.mxu1 %v2245_v61 }
 0x156   :  { %899 = vmatpush1.bf16.msra.mxu0 %v2257_v63  ;;  %940 = vmatpush1.bf16.msra.mxu1 %v2262_v0 }
 0x157   :  { %900 = vmatprep.subr.bf16.mxu0 %v2269_v2  ;;  %941 = vmatprep.subr.bf16.mxu1 %v2274_v3 }
 0x15a   :  { %901 = vmatpush1.bf16.msra.mxu0 %v2281_v4  ;;  %942 = vmatpush1.bf16.msra.mxu1 %v2286_v5 }
 0x15b   :  { %1004 = vmatprep.subr.bf16.mxu0 %v2085_v33  ;;  %1045 = vmatprep.subr.bf16.mxu1 %v2090_v34 }
 0x1fd   :  { %v802_v13 = vpop.f32.mrf.mxu0  ;;  %v843_v19 = vpop.f32.mrf.mxu1 }
 0x1fe   :  { %v850_v26 = vadd.f32 %v802_v13, %v2345_v24  ;;  %v852_v27 = vadd.f32 %v843_v19, %v2348_v25 }
 0x1ff   :  { %v804_v30 = vpop.f32.mrf.mxu0  ;;  %v845_v17 = vpop.f32.mrf.mxu1 }
 0x200   :  { %v1674_v23 = vmul.f32 -1.442695, %v850_v26  ;;  %v851_v53 = vadd.f32 %v804_v30, %v2350_v28  ;;  %v853_v9 = vadd.f32 %v845_v17, %v2353_v29 }
 0x201   :  { %v806_v7 = vpop.f32.mrf.mxu0  ;;  %v847_v11 = vpop.f32.mrf.mxu1 }
 0x202   :  { %1813 = vpow2.f32 %v1674_v23  ;;  %v1675_v21 = vmul.f32 -1.442695, %v851_v53  ;;  %v1676_v22 = vmul.f32 -1.442695, %v853_v9 }
 0x203   :  { %v807_v35 = vpop.f32.mrf.mxu0  ;;  %v848_v16 = vpop.f32.mrf.mxu1 }
 0x204   :  { %1815 = vpow2.f32 %v1675_v21 }
 0x205   :  { %1817 = vtanh.f32 %v852_v27 }
 0x206   :  { %1819 = vpow2.f32 %v1676_v22 }
 0x20f   :  { %v1814_v18 = vpop.eup %1813 }
 0x210   :  { %v857_v20 = vadd.f32 1.0, %v1814_v18 }
 0x211   :  { %v1816_v24 = vpop.eup %1815 }
 0x212   :  { %1821 = vrcp.f32 %v857_v20  ;;  %v863_v1 = vadd.f32 1.0, %v1816_v24  ;;  %v1818_v28 = vpop.eup %1817 }
 0x213   :  { %v1820_v14 = vpop.eup %1819 }
 0x214   :  { %1823 = vrcp.f32 %v863_v1  ;;  %v870_v26 = vadd.f32 1.0, %v1820_v14  ;;  %v2829_v1 = vld [vmem:[#allocation5_spill] sm:$0xff] }
 0x216   :  { %1825 = vrcp.f32 %v870_v26 }
 0x21f   :  { %v1822_v15 = vpop.eup %1821 }
 0x220   :  { %v874_v12 = vmul.f32 %v1822_v15, %v1818_v28 }
 0x221   :  { %v1824_v13 = vpop.eup %1823 }
 0x222   :  { %v873_v30 = vmul.f32 %v1824_v13, %v2421_v8 }
 0x223   :  { %v1826_v25 = vpop.eup %1825 }
 0x224   :  { %v2463_v29 = vadd.f32 %v874_v12, %v873_v30 }
 0x226   :  { %1827 = vtanh.f32 %v2463_v29 }
 0x233   :  { %v1828_v19 = vpop.eup %1827 }
 0x234   :  { %v877_v17 = vmul.f32 %v1828_v19, %v1826_v25 }
 0x236   :  { %v885_v23 = vpack.c.bf16 %v877_v17, %v877_v17 }
 0x238   :  { %919 = vmatmul.mubr.bf16.vlgmr.msra.gmra.mxu0 %v885_v23  ;;  %960 = vmatmul.mubr.bf16.vlgmr.msra.gmra.mxu1 %v885_v23 }
 0x239   :  { %1005 = vmatpush1.bf16.msra.mxu0 %v2098_v36  ;;  %1046 = vmatpush1.bf16.msra.mxu1 %v2103_v37 }
 0x23a   :  { %1006 = vmatprep.subr.bf16.mxu0 %v2110_v38  ;;  %1047 = vmatprep.subr.bf16.mxu1 %v2115_v39 }
 0x23b   :  { %1036 = vmatprep.mubr.bf16.mxu0 %v2828_v10  ;;  %1077 = vmatprep.mubr.bf16.mxu1 %v2828_v10 }
 0x23d   :  { %1007 = vmatpush1.bf16.msra.mxu0 %v2120_v40  ;;  %1048 = vmatpush1.bf16.msra.mxu1 %v2127_v41 }
 0x23e   :  { %1008 = vmatprep.subr.bf16.mxu0 %v2134_v42  ;;  %1049 = vmatprep.subr.bf16.mxu1 %v2139_v43 }
 0x241   :  { %1009 = vmatpush1.bf16.msra.mxu0 %v2149_v45  ;;  %1050 = vmatpush1.bf16.msra.mxu1 %v2154_v46 }
 0x242   :  { %1010 = vmatprep.subr.bf16.mxu0 %v2161_v47  ;;  %1051 = vmatprep.subr.bf16.mxu1 %v2168_v48 }
 0x245   :  { %1011 = vmatpush1.bf16.msra.mxu0 %v2173_v49  ;;  %1052 = vmatpush1.bf16.msra.mxu1 %v2178_v50 }
 0x246   :  { %1012 = vmatprep.subr.bf16.mxu0 %v2185_v51  ;;  %1053 = vmatprep.subr.bf16.mxu1 %v2192_v52 }
 0x249   :  { %1013 = vmatpush1.bf16.msra.mxu0 %v2204_v54  ;;  %1054 = vmatpush1.bf16.msra.mxu1 %v2209_v55 }
 0x24a   :  { %1014 = vmatprep.subr.bf16.mxu0 %v2216_v56  ;;  %1055 = vmatprep.subr.bf16.mxu1 %v2221_v57 }
 0x24d   :  { %1015 = vmatpush1.bf16.msra.mxu0 %v2228_v58  ;;  %1056 = vmatpush1.bf16.msra.mxu1 %v2233_v59 }
 0x24e   :  { %1016 = vmatprep.subr.bf16.mxu0 %v2240_v60  ;;  %1057 = vmatprep.subr.bf16.mxu1 %v2245_v61 }
 0x251   :  { %1017 = vmatpush1.bf16.msra.mxu0 %v2257_v63  ;;  %1058 = vmatpush1.bf16.msra.mxu1 %v2262_v0 }
 0x252   :  { %1018 = vmatprep.subr.bf16.mxu0 %v2269_v2  ;;  %1059 = vmatprep.subr.bf16.mxu1 %v2274_v3 }
 0x255   :  { %1019 = vmatpush1.bf16.msra.mxu0 %v2281_v4  ;;  %1060 = vmatpush1.bf16.msra.mxu1 %v2286_v5 }
 0x256   :  { %1122 = vmatprep.subr.bf16.mxu0 %v2085_v33  ;;  %1163 = vmatprep.subr.bf16.mxu1 %v2090_v34 }
 0x2f8   :  { %v920_v8 = vpop.f32.mrf.mxu0  ;;  %v961_v53 = vpop.f32.mrf.mxu1 }
 0x2f9   :  { %v968_v7 = vadd.f32 %v920_v8, %v2355_v32  ;;  %v970_v28 = vadd.f32 %v961_v53, %v2829_v1 }
 0x2fa   :  { %v922_v11 = vpop.f32.mrf.mxu0  ;;  %v963_v21 = vpop.f32.mrf.mxu1 }
 0x2fb   :  { %v1677_v35 = vmul.f32 -1.442695, %v968_v7  ;;  %v969_v16 = vadd.f32 %v922_v11, %v2360_v62  ;;  %v971_v24 = vadd.f32 %v963_v21, %v2363_v6 }
 0x2fc   :  { %v924_v9 = vpop.f32.mrf.mxu0  ;;  %v965_v27 = vpop.f32.mrf.mxu1 }
 0x2fd   :  { %1829 = vpow2.f32 %v1677_v35  ;;  %v1678_v22 = vmul.f32 -1.442695, %v969_v16  ;;  %v1679_v14 = vmul.f32 -1.442695, %v971_v24  ;;  %v2830_v35 = vld [vmem:[#allocation6_spill] sm:$0xff] }
 0x2fe   :  { %v925_v18 = vpop.f32.mrf.mxu0  ;;  %v966_v20 = vpop.f32.mrf.mxu1 }
 0x2ff   :  { %1831 = vpow2.f32 %v1678_v22  ;;  %v2831_v18 = vld [vmem:[#allocation8_spill] sm:$0xff] }
 0x300   :  { %1833 = vtanh.f32 %v970_v28 }
 0x301   :  { %1835 = vpow2.f32 %v1679_v14 }
 0x30a   :  { %v1830_v15 = vpop.eup %1829 }
 0x30b   :  { %v975_v12 = vadd.f32 1.0, %v1830_v15 }
 0x30c   :  { %v1832_v32 = vpop.eup %1831 }
 0x30d   :  { %1837 = vrcp.f32 %v975_v12  ;;  %v981_v13 = vadd.f32 1.0, %v1832_v32  ;;  %v1834_v62 = vpop.eup %1833  ;;  %v2832_v12 = vld [vmem:[#allocation9_spill] sm:$0xff]  ;;  %v2833_v32 = vld [vmem:[#allocation7_spill] sm:$0xff] }
 0x30e   :  { %v1836_v26 = vpop.eup %1835 }
 0x30f   :  { %1839 = vrcp.f32 %v981_v13  ;;  %v988_v17 = vadd.f32 1.0, %v1836_v26 }
 0x311   :  { %1841 = vrcp.f32 %v988_v17 }
 0x31a   :  { %v1838_v30 = vpop.eup %1837 }
 0x31b   :  { %v992_v25 = vmul.f32 %v1838_v30, %v1834_v62 }
 0x31c   :  { %v1840_v19 = vpop.eup %1839 }
 0x31d   :  { %v991_v23 = vmul.f32 %v1840_v19, %v2463_v29 }
 0x31e   :  { %v1842_v8 = vpop.eup %1841 }
 0x31f   :  { %v2505_v6 = vadd.f32 %v992_v25, %v991_v23 }
 0x321   :  { %1843 = vtanh.f32 %v2505_v6 }
 0x32e   :  { %v1844_v53 = vpop.eup %1843 }
 0x32f   :  { %v995_v7 = vmul.f32 %v1844_v53, %v1842_v8 }
 0x331   :  { %v1003_v11 = vpack.c.bf16 %v995_v7, %v995_v7 }
 0x333   :  { %1037 = vmatmul.mubr.bf16.vlgmr.msra.gmra.mxu0 %v1003_v11  ;;  %1078 = vmatmul.mubr.bf16.vlgmr.msra.gmra.mxu1 %v1003_v11 }
 0x334   :  { %1123 = vmatpush1.bf16.msra.mxu0 %v2098_v36  ;;  %1164 = vmatpush1.bf16.msra.mxu1 %v2103_v37 }
 0x335   :  { %1124 = vmatprep.subr.bf16.mxu0 %v2110_v38  ;;  %1165 = vmatprep.subr.bf16.mxu1 %v2115_v39 }
 0x336   :  { %1154 = vmatprep.mubr.bf16.mxu0 %v2828_v10  ;;  %1195 = vmatprep.mubr.bf16.mxu1 %v2828_v10 }
 0x338   :  { %1125 = vmatpush1.bf16.msra.mxu0 %v2120_v40  ;;  %1166 = vmatpush1.bf16.msra.mxu1 %v2127_v41 }
 0x339   :  { %1126 = vmatprep.subr.bf16.mxu0 %v2134_v42  ;;  %1167 = vmatprep.subr.bf16.mxu1 %v2139_v43 }
 0x33c   :  { %1127 = vmatpush1.bf16.msra.mxu0 %v2149_v45  ;;  %1168 = vmatpush1.bf16.msra.mxu1 %v2154_v46 }
 0x33d   :  { %1128 = vmatprep.subr.bf16.mxu0 %v2161_v47  ;;  %1169 = vmatprep.subr.bf16.mxu1 %v2168_v48 }
 0x340   :  { %1129 = vmatpush1.bf16.msra.mxu0 %v2173_v49  ;;  %1170 = vmatpush1.bf16.msra.mxu1 %v2178_v50 }
 0x341   :  { %1130 = vmatprep.subr.bf16.mxu0 %v2185_v51  ;;  %1171 = vmatprep.subr.bf16.mxu1 %v2192_v52 }
 0x344   :  { %1131 = vmatpush1.bf16.msra.mxu0 %v2204_v54  ;;  %1172 = vmatpush1.bf16.msra.mxu1 %v2209_v55 }
 0x345   :  { %1132 = vmatprep.subr.bf16.mxu0 %v2216_v56  ;;  %1173 = vmatprep.subr.bf16.mxu1 %v2221_v57 }
 0x348   :  { %1133 = vmatpush1.bf16.msra.mxu0 %v2228_v58  ;;  %1174 = vmatpush1.bf16.msra.mxu1 %v2233_v59 }
 0x349   :  { %1134 = vmatprep.subr.bf16.mxu0 %v2240_v60  ;;  %1175 = vmatprep.subr.bf16.mxu1 %v2245_v61 }
 0x34c   :  { %1135 = vmatpush1.bf16.msra.mxu0 %v2257_v63  ;;  %1176 = vmatpush1.bf16.msra.mxu1 %v2262_v0 }
 0x34d   :  { %1136 = vmatprep.subr.bf16.mxu0 %v2269_v2  ;;  %1177 = vmatprep.subr.bf16.mxu1 %v2274_v3 }
 0x350   :  { %1137 = vmatpush1.bf16.msra.mxu0 %v2281_v4  ;;  %1178 = vmatpush1.bf16.msra.mxu1 %v2286_v5 }
 0x351   :  { %1240 = vmatprep.subr.bf16.mxu0 %v2085_v33  ;;  %1281 = vmatprep.subr.bf16.mxu1 %v2090_v34 }
 0x3f3   :  { %v1038_v29 = vpop.f32.mrf.mxu0  ;;  %v1079_v21 = vpop.f32.mrf.mxu1 }
 0x3f4   :  { %v1086_v16 = vadd.f32 %v1038_v29, %v2830_v35  ;;  %v1088_v34 = vadd.f32 %v1079_v21, %v2833_v32 }
 0x3f5   :  { %v1040_v9 = vpop.f32.mrf.mxu0  ;;  %v1081_v27 = vpop.f32.mrf.mxu1 }
 0x3f6   :  { %v1680_v22 = vmul.f32 -1.442695, %v1086_v16  ;;  %v1087_v20 = vadd.f32 %v1040_v9, %v2831_v18  ;;  %v1089_v33 = vadd.f32 %v1081_v27, %v2832_v12 }
 0x3f7   :  { %v1042_v24 = vpop.f32.mrf.mxu0  ;;  %v1083_v1 = vpop.f32.mrf.mxu1 }
 0x3f8   :  { %1845 = vpow2.f32 %v1680_v22  ;;  %v1681_v28 = vmul.f32 -1.442695, %v1087_v20  ;;  %v1682_v13 = vmul.f32 -1.442695, %v1089_v33 }
 0x3f9   :  { %v1043_v14 = vpop.f32.mrf.mxu0  ;;  %v1084_v15 = vpop.f32.mrf.mxu1 }
 0x3fa   :  { %1847 = vpow2.f32 %v1681_v28 }
 0x3fb   :  { %1849 = vtanh.f32 %v1088_v34 }
 0x3fc   :  { %1851 = vpow2.f32 %v1682_v13 }
 0x405   :  { %v1846_v62 = vpop.eup %1845 }
 0x406   :  { %v1093_v26 = vadd.f32 1.0, %v1846_v62 }
 0x407   :  { %v1848_v30 = vpop.eup %1847 }
 0x408   :  { %1853 = vrcp.f32 %v1093_v26  ;;  %v1099_v25 = vadd.f32 1.0, %v1848_v30  ;;  %v1850_v19 = vpop.eup %1849 }
 0x409   :  { %v1852_v17 = vpop.eup %1851 }
 0x40a   :  { %1855 = vrcp.f32 %v1099_v25  ;;  %v1106_v7 = vadd.f32 1.0, %v1852_v17  ;;  %v2611_v17 = vld [vmem:[%s2804_s2 + $0xe8] ss:$16 sps:$4 sm:$0xff]  }
 0x40c   :  { %1857 = vrcp.f32 %v1106_v7  ;;  %v2637_v7 = vld [vmem:[%s2804_s2 + $0xc8] ss:$16 sps:$4 sm:$0xff]  }
 0x415   :  { %v1854_v23 = vpop.eup %1853 }
 0x416   :  { %v1110_v8 = vmul.f32 %v1854_v23, %v1850_v19  ;;  %v2605_v19 = vld [vmem:[%s2804_s2 + $0xe0] ss:$16 sps:$4 sm:$0xff]   ;;  %v2617_v23 = vld [vmem:[%s2804_s2 + $0xc4] ss:$16 sps:$4 sm:$0xff]  }
 0x417   :  { %v1856_v53 = vpop.eup %1855 }
 0x418   :  { %v1109_v11 = vmul.f32 %v1856_v53, %v2505_v6  ;;  %v2837_v6 = vld [vmem:[#allocation11_spill] sm:$0xff] }
 0x419   :  { %v1858_v21 = vpop.eup %1857  ;;  %v2631_v53 = vld [vmem:[%s2804_s2 + $0xc0] ss:$16 sps:$4 sm:$0xff]  }
 0x41a   :  { %v2547_v29 = vadd.f32 %v1110_v8, %v1109_v11  ;;  %v2623_v8 = vld [vmem:[%s2804_s2 + $0xcc] ss:$16 sps:$4 sm:$0xff]   ;;  %v2643_v11 = vld [vmem:[%s2804_s2 + $0xa4] ss:$16 sps:$4 sm:$0xff]  }
 0x41c   :  { %1859 = vtanh.f32 %v2547_v29 }
 0x429   :  { %v1860_v35 = vpop.eup %1859 }
 0x42a   :  { %v1113_v16 = vmul.f32 %v1860_v35, %v1858_v21  ;;  %v2655_v21 = vld [vmem:[%s2804_s2 + $0xa0] ss:$16 sps:$4 sm:$0xff]   ;;  %v2661_v35 = vld [vmem:[%s2804_s2 + $0xa8] ss:$16 sps:$4 sm:$0xff]  }
 0x42c   :  { %v1121_v9 = vpack.c.bf16 %v1113_v16, %v1113_v16  ;;  %v2667_v16 = vld [vmem:[%s2804_s2 + $0x84] ss:$16 sps:$4 sm:$0xff]  }
 0x42e   :  { %1155 = vmatmul.mubr.bf16.vlgmr.msra.gmra.mxu0 %v1121_v9  ;;  %1196 = vmatmul.mubr.bf16.vlgmr.msra.gmra.mxu1 %v1121_v9  ;;  %v2673_v9 = vld [vmem:[%s2804_s2 + $0x8c] ss:$16 sps:$4 sm:$0xff]  }
 0x42f   :  { %1241 = vmatpush1.bf16.msra.mxu0 %v2098_v36  ;;  %1282 = vmatpush1.bf16.msra.mxu1 %v2103_v37  ;;  %v2585_v36 = vld [vmem:[%s2804_s2 + $0xe4] ss:$16 sps:$4 sm:$0xff]   ;;  %v2591_v37 = vld [vmem:[%s2804_s2 + $0xec] ss:$16 sps:$4 sm:$0xff]  }
 0x430   :  { %1242 = vmatprep.subr.bf16.mxu0 %v2110_v38  ;;  %1283 = vmatprep.subr.bf16.mxu1 %v2115_v39 }
 0x431   :  { %1272 = vmatprep.mubr.bf16.mxu0 %v2828_v10  ;;  %1313 = vmatprep.mubr.bf16.mxu1 %v2828_v10 }
 0x433   :  { %1243 = vmatpush1.bf16.msra.mxu0 %v2120_v40  ;;  %1284 = vmatpush1.bf16.msra.mxu1 %v2127_v41  ;;  %v2834_v40 = vld [vmem:[#allocation10_spill] sm:$0xff] }
 0x434   :  { %1244 = vmatprep.subr.bf16.mxu0 %v2134_v42  ;;  %1285 = vmatprep.subr.bf16.mxu1 %v2139_v43 }
 0x437   :  { %1245 = vmatpush1.bf16.msra.mxu0 %v2149_v45  ;;  %1286 = vmatpush1.bf16.msra.mxu1 %v2154_v46  ;;  %v2835_v46 = vld [vmem:[#allocation12_spill] sm:$0xff] }
 0x438   :  { %1246 = vmatprep.subr.bf16.mxu0 %v2161_v47  ;;  %1287 = vmatprep.subr.bf16.mxu1 %v2168_v48 }
 0x43b   :  { %1247 = vmatpush1.bf16.msra.mxu0 %v2173_v49  ;;  %1288 = vmatpush1.bf16.msra.mxu1 %v2178_v50 }
 0x43c   :  { %1248 = vmatprep.subr.bf16.mxu0 %v2185_v51  ;;  %1289 = vmatprep.subr.bf16.mxu1 %v2192_v52 }
 0x43f   :  { %1249 = vmatpush1.bf16.msra.mxu0 %v2204_v54  ;;  %1290 = vmatpush1.bf16.msra.mxu1 %v2209_v55  ;;  %v2836_v54 = vld [vmem:[#allocation13_spill] sm:$0xff] }
 0x440   :  { %1250 = vmatprep.subr.bf16.mxu0 %v2216_v56  ;;  %1291 = vmatprep.subr.bf16.mxu1 %v2221_v57 }
 0x443   :  { %1251 = vmatpush1.bf16.msra.mxu0 %v2228_v58  ;;  %1292 = vmatpush1.bf16.msra.mxu1 %v2233_v59 }
 0x444   :  { %1252 = vmatprep.subr.bf16.mxu0 %v2240_v60  ;;  %1293 = vmatprep.subr.bf16.mxu1 %v2245_v61 }
 0x447   :  { %1253 = vmatpush1.bf16.msra.mxu0 %v2257_v63  ;;  %1294 = vmatpush1.bf16.msra.mxu1 %v2262_v0 }
 0x448   :  { %1254 = vmatprep.subr.bf16.mxu0 %v2269_v2  ;;  %1295 = vmatprep.subr.bf16.mxu1 %v2274_v3 }
 0x44b   :  { %1255 = vmatpush1.bf16.msra.mxu0 %v2281_v4  ;;  %1296 = vmatpush1.bf16.msra.mxu1 %v2286_v5 }
 0x44c   :  { %1358 = vmatprep.subr.bf16.mxu0 %v2585_v36  ;;  %1399 = vmatprep.subr.bf16.mxu1 %v2591_v37 }
 0x4ee   :  { %v1156_v38 = vpop.f32.mrf.mxu0  ;;  %v1197_v39 = vpop.f32.mrf.mxu1 }
 0x4ef   :  { %v1204_v41 = vadd.f32 %v1156_v38, %v2834_v40  ;;  %v1206_v27 = vadd.f32 %v1197_v39, %v2837_v6  ;;  %v2679_v38 = vld [vmem:[%s2804_s2 + $0x80] ss:$16 sps:$4 sm:$0xff]   ;;  %v2685_v39 = vld [vmem:[%s2804_s2 + $0x88] ss:$16 sps:$4 sm:$0xff]   ;;  %v2691_v40 = vld [vmem:[%s2804_s2 + $0x64] ss:$16 sps:$4 sm:$0xff]  }
 0x4f0   :  { %v1158_v42 = vpop.f32.mrf.mxu0  ;;  %v1199_v43 = vpop.f32.mrf.mxu1 }
 0x4f1   :  { %v1683_v45 = vmul.f32 -1.442695, %v1204_v41  ;;  %v1205_v47 = vadd.f32 %v1158_v42, %v2835_v46  ;;  %v1207_v55 = vadd.f32 %v1199_v43, %v2836_v54  ;;  %v2697_v41 = vld [vmem:[%s2804_s2 + $0x6c] ss:$16 sps:$4 sm:$0xff]   ;;  %v2703_v42 = vld [vmem:[%s2804_s2 + $0x60] ss:$16 sps:$4 sm:$0xff]  }
 0x4f2   :  { %v1160_v48 = vpop.f32.mrf.mxu0  ;;  %v1201_v49 = vpop.f32.mrf.mxu1  ;;  %v2709_v43 = vld [vmem:[%s2804_s2 + $0x68] ss:$16 sps:$4 sm:$0xff]  }
 0x4f3   :  { %1861 = vpow2.f32 %v1683_v45  ;;  %v1684_v50 = vmul.f32 -1.442695, %v1205_v47  ;;  %v1685_v22 = vmul.f32 -1.442695, %v1207_v55  ;;  %v2841_v48 = vld [vmem:[#allocation15_spill] sm:$0xff] }
 0x4f4   :  { %v1161_v51 = vpop.f32.mrf.mxu0  ;;  %v1202_v52 = vpop.f32.mrf.mxu1 }
 0x4f5   :  { %1863 = vpow2.f32 %v1684_v50 }
 0x4f6   :  { %1865 = vtanh.f32 %v1206_v27 }
 0x4f7   :  { %1867 = vpow2.f32 %v1685_v22 }
 0x500   :  { %v1862_v18 = vpop.eup %1861 }
 0x501   :  { %v1211_v20 = vadd.f32 1.0, %v1862_v18 }
 0x502   :  { %v1864_v24 = vpop.eup %1863 }
 0x503   :  { %1869 = vrcp.f32 %v1211_v20  ;;  %v1217_v1 = vadd.f32 1.0, %v1864_v24  ;;  %v1866_v28 = vpop.eup %1865 }
 0x504   :  { %v1868_v14 = vpop.eup %1867 }
 0x505   :  { %1871 = vrcp.f32 %v1217_v1  ;;  %v1224_v32 = vadd.f32 1.0, %v1868_v14 }
 0x507   :  { %1873 = vrcp.f32 %v1224_v32  ;;  %v1947_v32 = vld [vmem:[%s2804_s2 + $0x40] ss:$16 sps:$4 sm:$0xff]  }
 0x510   :  { %v1870_v15 = vpop.eup %1869 }
 0x511   :  { %v1228_v12 = vmul.f32 %v1870_v15, %v1866_v28 }
 0x512   :  { %v1872_v33 = vpop.eup %1871 }
 0x513   :  { %v1227_v34 = vmul.f32 %v1872_v33, %v2547_v29  ;;  %v2649_v29 = vld [vmem:[%s2804_s2 + $0xac] ss:$16 sps:$4 sm:$0xff]  }
 0x514   :  { %v1874_v62 = vpop.eup %1873  ;;  %v1946_v33 = vld [vmem:[%s2804_s2 + $0x4c] ss:$16 sps:$4 sm:$0xff]  }
 0x515   :  { %v2599_v13 = vadd.f32 %v1228_v12, %v1227_v34  ;;  %v1948_v34 = vld [vmem:[%s2804_s2 + $0x48] ss:$16 sps:$4 sm:$0xff]  }
 0x517   :  { %1875 = vtanh.f32 %v2599_v13 }
 0x524   :  { %v1876_v26 = vpop.eup %1875 }
 0x525   :  { %v1231_v30 = vmul.f32 %v1876_v26, %v1874_v62  ;;  %v1950_v62 = vld [vmem:[%s2804_s2 + $0x2c] ss:$16 sps:$4 sm:$0xff]   ;;  %v1951_v26 = vld [vmem:[%s2804_s2 + $0x20] ss:$16 sps:$4 sm:$0xff]  }
 0x527   :  { %v1239_v25 = vpack.c.bf16 %v1231_v30, %v1231_v30  ;;  %v1952_v30 = vld [vmem:[%s2804_s2 + $0x28] ss:$16 sps:$4 sm:$0xff]  }
 0x529   :  { %1273 = vmatmul.mubr.bf16.vlgmr.msra.gmra.mxu0 %v1239_v25  ;;  %1314 = vmatmul.mubr.bf16.vlgmr.msra.gmra.mxu1 %v1239_v25  ;;  %v1953_v25 = vld [vmem:[%s2804_s2 + $0x4] ss:$16 sps:$4 sm:$0xff]  }
 0x52a   :  { %1359 = vmatpush1.bf16.msra.mxu0 %v2605_v19  ;;  %1400 = vmatpush1.bf16.msra.mxu1 %v2611_v17 }
 0x52b   :  { %1360 = vmatprep.subr.bf16.mxu0 %v2617_v23  ;;  %1401 = vmatprep.subr.bf16.mxu1 %v2623_v8 }
 0x52c   :  { %1390 = vmatprep.mubr.bf16.mxu0 %v2828_v10  ;;  %1431 = vmatprep.mubr.bf16.mxu1 %v2828_v10 }
 0x52e   :  { %1361 = vmatpush1.bf16.msra.mxu0 %v2631_v53  ;;  %1402 = vmatpush1.bf16.msra.mxu1 %v2637_v7 }
 0x52f   :  { %1362 = vmatprep.subr.bf16.mxu0 %v2643_v11  ;;  %1403 = vmatprep.subr.bf16.mxu1 %v2649_v29 }
 0x532   :  { %1363 = vmatpush1.bf16.msra.mxu0 %v2655_v21  ;;  %1404 = vmatpush1.bf16.msra.mxu1 %v2661_v35 }
 0x533   :  { %1364 = vmatprep.subr.bf16.mxu0 %v2667_v16  ;;  %1405 = vmatprep.subr.bf16.mxu1 %v2673_v9 }
 0x536   :  { %1365 = vmatpush1.bf16.msra.mxu0 %v2679_v38  ;;  %1406 = vmatpush1.bf16.msra.mxu1 %v2685_v39 }
 0x537   :  { %1366 = vmatprep.subr.bf16.mxu0 %v2691_v40  ;;  %1407 = vmatprep.subr.bf16.mxu1 %v2697_v41 }
 0x53a   :  { %1367 = vmatpush1.bf16.msra.mxu0 %v2703_v42  ;;  %1408 = vmatpush1.bf16.msra.mxu1 %v2709_v43 }
 0x53b   :  { %1368 = vmatprep.subr.bf16.mxu0 %v2216_v56  ;;  %1409 = vmatprep.subr.bf16.mxu1 %v2221_v57 }
 0x53e   :  { %1369 = vmatpush1.bf16.msra.mxu0 %v2228_v58  ;;  %1410 = vmatpush1.bf16.msra.mxu1 %v2233_v59  ;;  %v2838_v58 = vld [vmem:[#allocation14_spill] sm:$0xff] }
 0x53f   :  { %1370 = vmatprep.subr.bf16.mxu0 %v2240_v60  ;;  %1411 = vmatprep.subr.bf16.mxu1 %v2245_v61 }
 0x542   :  { %1371 = vmatpush1.bf16.msra.mxu0 %v2257_v63  ;;  %1412 = vmatpush1.bf16.msra.mxu1 %v2262_v0  ;;  %v2839_v0 = vld [vmem:[#allocation16_spill] sm:$0xff] }
 0x543   :  { %1372 = vmatprep.subr.bf16.mxu0 %v2269_v2  ;;  %1413 = vmatprep.subr.bf16.mxu1 %v2274_v3 }
 0x546   :  { %1373 = vmatpush1.bf16.msra.mxu0 %v2281_v4  ;;  %1414 = vmatpush1.bf16.msra.mxu1 %v2286_v5  ;;  %v2840_v5 = vld [vmem:[#allocation17_spill] sm:$0xff] }
 0x547   :  { %1476 = vmatprep.subr.bf16.mxu0 %v2585_v36  ;;  %1517 = vmatprep.subr.bf16.mxu1 %v2591_v37 }
 0x5e9   :  { %v1274_v56 = vpop.f32.mrf.mxu0  ;;  %v1315_v57 = vpop.f32.mrf.mxu1 }
 0x5ea   :  { %v1322_v59 = vadd.f32 %v1274_v56, %v2838_v58  ;;  %v1324_v37 = vadd.f32 %v1315_v57, %v2841_v48  ;;  %v2845_v57 = vld [vmem:[#allocation19_spill] sm:$0xff] }
 0x5eb   :  { %v1276_v60 = vpop.f32.mrf.mxu0  ;;  %v1317_v61 = vpop.f32.mrf.mxu1 }
 0x5ec   :  { %v1686_v63 = vmul.f32 -1.442695, %v1322_v59  ;;  %v1323_v45 = vadd.f32 %v1276_v60, %v2839_v0  ;;  %v1325_v36 = vadd.f32 %v1317_v61, %v2840_v5 }
 0x5ed   :  { %v1278_v2 = vpop.f32.mrf.mxu0  ;;  %v1319_v46 = vpop.f32.mrf.mxu1 }
 0x5ee   :  { %1877 = vpow2.f32 %v1686_v63  ;;  %v1687_v3 = vmul.f32 -1.442695, %v1323_v45  ;;  %v1688_v49 = vmul.f32 -1.442695, %v1325_v36 }
 0x5ef   :  { %v1279_v4 = vpop.f32.mrf.mxu0  ;;  %v1320_v47 = vpop.f32.mrf.mxu1 }
 0x5f0   :  { %1879 = vpow2.f32 %v1687_v3 }
 0x5f1   :  { %1881 = vtanh.f32 %v1324_v37 }
 0x5f2   :  { %1883 = vpow2.f32 %v1688_v49 }
 0x5fb   :  { %v1878_v50 = vpop.eup %1877 }
 0x5fc   :  { %v1329_v51 = vadd.f32 1.0, %v1878_v50 }
 0x5fd   :  { %v1880_v52 = vpop.eup %1879 }
 0x5fe   :  { %1885 = vrcp.f32 %v1329_v51  ;;  %v1335_v54 = vadd.f32 1.0, %v1880_v52  ;;  %v1882_v55 = vpop.eup %1881 }
 0x5ff   :  { %v1884_v6 = vpop.eup %1883 }
 0x600   :  { %1887 = vrcp.f32 %v1335_v54  ;;  %v1342_v20 = vadd.f32 1.0, %v1884_v6  ;;  %v2846_v54 = vld [vmem:[#allocation22_spill] sm:$0xff] }
 0x602   :  { %1889 = vrcp.f32 %v1342_v20 }
 0x60b   :  { %v1886_v27 = vpop.eup %1885 }
 0x60c   :  { %v1346_v22 = vmul.f32 %v1886_v27, %v1882_v55 }
 0x60d   :  { %v1888_v18 = vpop.eup %1887 }
 0x60e   :  { %v1345_v24 = vmul.f32 %v1888_v18, %v2599_v13  ;;  %v1949_v13 = vld [vmem:[%s2804_s2 + $0x24] ss:$16 sps:$4 sm:$0xff]  }
 0x60f   :  { %v1890_v28 = vpop.eup %1889 }
 0x610   :  { %v2731_v1 = vadd.f32 %v1346_v22, %v1345_v24 }
 0x612   :  { %1891 = vtanh.f32 %v2731_v1 }
 0x61f   :  { %v1892_v14 = vpop.eup %1891 }
 0x620   :  { %v1349_v15 = vmul.f32 %v1892_v14, %v1890_v28 }
 0x622   :  { %v1357_v12 = vpack.c.bf16 %v1349_v15, %v1349_v15 }
 0x624   :  { %1391 = vmatmul.mubr.bf16.vlgmr.msra.gmra.mxu0 %v1357_v12  ;;  %1432 = vmatmul.mubr.bf16.vlgmr.msra.gmra.mxu1 %v1357_v12  ;;  %v2847_v12 = vld [vmem:[#allocation23_spill] sm:$0xff] }
 0x625   :  { %1477 = vmatpush1.bf16.msra.mxu0 %v2605_v19  ;;  %1518 = vmatpush1.bf16.msra.mxu1 %v2611_v17  ;;  %v1954_v19 = vld [vmem:[%s2804_s2 + $0xc] ss:$16 sps:$4 sm:$0xff]   ;;  %v1955_v17 = vld [vmem:[%s2804_s2] ss:$16 sps:$4 sm:$0xff]  }
 0x626   :  { %1478 = vmatprep.subr.bf16.mxu0 %v2617_v23  ;;  %1519 = vmatprep.subr.bf16.mxu1 %v2623_v8  ;;  %v1956_v23 = vld [vmem:[%s2804_s2 + $0x8] ss:$16 sps:$4 sm:$0xff]  }
 0x627   :  { %1508 = vmatprep.mubr.bf16.mxu0 %v2828_v10  ;;  %1549 = vmatprep.mubr.bf16.mxu1 %v2828_v10  ;;  %v1945_v10 = vld [vmem:[%s2804_s2 + $0x44] ss:$16 sps:$4 sm:$0xff]  }
 0x629   :  { %1479 = vmatpush1.bf16.msra.mxu0 %v2631_v53  ;;  %1520 = vmatpush1.bf16.msra.mxu1 %v2637_v7  ;;  %v2842_v7 = vld [vmem:[#allocation18_spill] sm:$0xff] }
 0x62a   :  { %1480 = vmatprep.subr.bf16.mxu0 %v2643_v11  ;;  %1521 = vmatprep.subr.bf16.mxu1 %v2649_v29 }
 0x62d   :  { %1481 = vmatpush1.bf16.msra.mxu0 %v2655_v21  ;;  %1522 = vmatpush1.bf16.msra.mxu1 %v2661_v35 }
 0x62e   :  { %1482 = vmatprep.subr.bf16.mxu0 %v2667_v16  ;;  %1523 = vmatprep.subr.bf16.mxu1 %v2673_v9  ;;  %v2843_v16 = vld [vmem:[#allocation20_spill] sm:$0xff] }
 0x631   :  { %1483 = vmatpush1.bf16.msra.mxu0 %v2679_v38  ;;  %1524 = vmatpush1.bf16.msra.mxu1 %v2685_v39 }
 0x632   :  { %1484 = vmatprep.subr.bf16.mxu0 %v2691_v40  ;;  %1525 = vmatprep.subr.bf16.mxu1 %v2697_v41 }
 0x635   :  { %1485 = vmatpush1.bf16.msra.mxu0 %v2703_v42  ;;  %1526 = vmatpush1.bf16.msra.mxu1 %v2709_v43  ;;  %v2844_v43 = vld [vmem:[#allocation21_spill] sm:$0xff] }
 0x636   :  { %1486 = vmatprep.subr.bf16.mxu0 %v1945_v10  ;;  %1527 = vmatprep.subr.bf16.mxu1 %v1946_v33 }
 0x639   :  { %1487 = vmatpush1.bf16.msra.mxu0 %v1947_v32  ;;  %1528 = vmatpush1.bf16.msra.mxu1 %v1948_v34 }
 0x63a   :  { %1488 = vmatprep.subr.bf16.mxu0 %v1949_v13  ;;  %1529 = vmatprep.subr.bf16.mxu1 %v1950_v62 }
 0x63d   :  { %1489 = vmatpush1.bf16.msra.mxu0 %v1951_v26  ;;  %1530 = vmatpush1.bf16.msra.mxu1 %v1952_v30 }
 0x63e   :  { %1490 = vmatprep.subr.bf16.mxu0 %v1953_v25  ;;  %1531 = vmatprep.subr.bf16.mxu1 %v1954_v19 }
 0x641   :  { %1491 = vmatpush1.bf16.msra.mxu0 %v1955_v17  ;;  %1532 = vmatpush1.bf16.msra.mxu1 %v1956_v23 }
 0x6e4   :  { %v1392_v8 = vpop.f32.mrf.mxu0  ;;  %v1433_v53 = vpop.f32.mrf.mxu1 }
 0x6e5   :  { %v1440_v11 = vadd.f32 %v1392_v8, %v2842_v7  ;;  %v1442_v58 = vadd.f32 %v1433_v53, %v2845_v57 }
 0x6e6   :  { %v1394_v29 = vpop.f32.mrf.mxu0  ;;  %v1435_v21 = vpop.f32.mrf.mxu1 }
 0x6e7   :  { %v1689_v35 = vmul.f32 -1.442695, %v1440_v11  ;;  %v1441_v9 = vadd.f32 %v1394_v29, %v2843_v16  ;;  %v1443_v56 = vadd.f32 %v1435_v21, %v2844_v43 }
 0x6e8   :  { %v1396_v38 = vpop.f32.mrf.mxu0  ;;  %v1437_v39 = vpop.f32.mrf.mxu1 }
 0x6e9   :  { %1893 = vpow2.f32 %v1689_v35  ;;  %v1690_v40 = vmul.f32 -1.442695, %v1441_v9  ;;  %v1691_v59 = vmul.f32 -1.442695, %v1443_v56 }
 0x6ea   :  { %v1397_v41 = vpop.f32.mrf.mxu0  ;;  %v1438_v42 = vpop.f32.mrf.mxu1 }
 0x6eb   :  { %1895 = vpow2.f32 %v1690_v40 }
 0x6ec   :  { %1897 = vtanh.f32 %v1442_v58 }
 0x6ed   :  { %1899 = vpow2.f32 %v1691_v59 }
 0x6f6   :  { %v1894_v60 = vpop.eup %1893 }
 0x6f7   :  { %v1447_v61 = vadd.f32 1.0, %v1894_v60 }
 0x6f8   :  { %v1896_v63 = vpop.eup %1895 }
 0x6f9   :  { %1901 = vrcp.f32 %v1447_v61  ;;  %v1453_v0 = vadd.f32 1.0, %v1896_v63  ;;  %v1898_v45 = vpop.eup %1897 }
 0x6fa   :  { %v1900_v2 = vpop.eup %1899 }
 0x6fb   :  { %1903 = vrcp.f32 %v1453_v0  ;;  %v1460_v47 = vadd.f32 1.0, %v1900_v2 }
 0x6fd   :  { %1905 = vrcp.f32 %v1460_v47 }
 0x706   :  { %v1902_v46 = vpop.eup %1901 }
 0x707   :  { %v1464_v3 = vmul.f32 %v1902_v46, %v1898_v45 }
 0x708   :  { %v1904_v4 = vpop.eup %1903 }
 0x709   :  { %v1463_v5 = vmul.f32 %v1904_v4, %v2731_v1 }
 0x70a   :  { %v1906_v48 = vpop.eup %1905 }
 0x70b   :  { %v1465_v36 = vadd.f32 %v1464_v3, %v1463_v5 }
 0x70d   :  { %1907 = vtanh.f32 %v1465_v36 }
 0x71a   :  { %v1908_v37 = vpop.eup %1907 }
 0x71b   :  { %v1467_v49 = vmul.f32 %v1908_v37, %v1906_v48 }
 0x71d   :  { %v1475_v50 = vpack.c.bf16 %v1467_v49, %v1467_v49 }
 0x71f   :  { %1509 = vmatmul.mubr.bf16.vlgmr.msra.gmra.mxu0 %v1475_v50  ;;  %1550 = vmatmul.mubr.bf16.vlgmr.msra.gmra.mxu1 %v1475_v50 }
 0x7df   :  { %v1510_v51 = vpop.f32.mrf.mxu0  ;;  %v1551_v52 = vpop.f32.mrf.mxu1 }
 0x7e0   :  { %v1558_v55 = vadd.f32 %v1510_v51, %v2846_v54  ;;  %v1560_v10 = vadd.f32 %v1551_v52, %v2847_v12 }
 0x7e1   :  { %v1512_v6 = vpop.f32.mrf.mxu0  ;;  %v1553_v27 = vpop.f32.mrf.mxu1 }
 0x7e2   :  { %v1692_v22 = vmul.f32 -1.442695, %v1558_v55  ;;  %v1559_v18 = vadd.f32 %v1512_v6, %v2411_v31  ;;  %v1561_v15 = vadd.f32 %v1553_v27, %v2414_v44 }
 0x7e3   :  { %v1514_v20 = vpop.f32.mrf.mxu0  ;;  %v1555_v24 = vpop.f32.mrf.mxu1 }
 0x7e4   :  { %1909 = vpow2.f32 %v1692_v22  ;;  %v1693_v1 = vmul.f32 -1.442695, %v1559_v18  ;;  %v1694_v33 = vmul.f32 -1.442695, %v1561_v15 }
 0x7e5   :  { %v1515_v28 = vpop.f32.mrf.mxu0  ;;  %v1556_v14 = vpop.f32.mrf.mxu1 }
 0x7e6   :  { %1911 = vpow2.f32 %v1693_v1 }
 0x7e7   :  { %1913 = vtanh.f32 %v1560_v10 }
 0x7e8   :  { %1915 = vpow2.f32 %v1694_v33 }
 0x7f1   :  { %v1910_v32 = vpop.eup %1909 }
 0x7f2   :  { %v1565_v34 = vadd.f32 1.0, %v1910_v32 }
 0x7f3   :  { %v1912_v13 = vpop.eup %1911 }
 0x7f4   :  { %1917 = vrcp.f32 %v1565_v34  ;;  %v1571_v62 = vadd.f32 1.0, %v1912_v13  ;;  %v1914_v31 = vpop.eup %1913 }
 0x7f5   :  { %v1916_v26 = vpop.eup %1915 }
 0x7f6   :  { %1919 = vrcp.f32 %v1571_v62  ;;  %v1578_v17 = vadd.f32 1.0, %v1916_v26 }
 0x7f8   :  { %1921 = vrcp.f32 %v1578_v17 }
 0x801   :  { %v1918_v30 = vpop.eup %1917 }
 0x802   :  { %v1582_v25 = vmul.f32 %v1918_v30, %v1914_v31 }
 0x803   :  { %v1920_v19 = vpop.eup %1919 }
 0x804   :  { %v1581_v23 = vmul.f32 %v1920_v19, %v1465_v36 }
 0x805   :  { %v1922_v44 = vpop.eup %1921 }
 0x806   :  { %v1583_v8 = vadd.f32 %v1582_v25, %v1581_v23 }
 0x808   :  { %1923 = vtanh.f32 %v1583_v8 }
 0x815   :  { %v1924_v53 = vpop.eup %1923 }
 0x816   :  { %v1585_v7 = vmul.f32 %v1924_v53, %v1922_v44 }
 0x818   :  { %1591 = vst [vmem:[%s2806_s4] sm:$0xff] %v1585_v7 }

</bundles_post_ra>
